<compile_context>
chip_gen: v7x
topology: tpu7x:2x2x1
jax: 0.10.0
libtpu: 0.0.40
codegen_flags: <defaults>
</compile_context>

<pallas_src>
import jax
import jax.numpy as jnp
import numpy as np
from jax import lax
from jax.experimental import pallas as pl
from jax.experimental.pallas import tpu as pltpu

LANE = 128
NEG = -1e9                 # finite "minus infinity" for masked logits (no NaN even if a row is fully masked)
# Set to jnp.bfloat16 on v6e/v7x for production shapes (fast MXU path, half the
# weight DMA/VMEM bytes); kept f32 here so the tight numerical check holds.
MATMUL_DTYPE = jnp.float32


def _ceil_to(x, m):
    return ((x + m - 1) // m) * m


def _segments(E, A):
    """128-lane-aligned column offsets of the fused first-stage weight matrix."""
    off_rule = 0
    off_tok = off_rule + _ceil_to(E, LANE)
    off_ptr = off_tok + _ceil_to(E, LANE)
    off_gen = off_ptr + _ceil_to(A, LANE)
    total = off_gen + _ceil_to(3, LANE)
    return off_rule, off_tok, off_ptr, off_gen, total


# ----------------------------------------------------------------------------
# Parameter packing: fuse/pad the torch-equivalent raw parameters.
# ----------------------------------------------------------------------------
def pack_params(raw, rule_size, token_size):
    H, E = raw["w_rule"].shape
    Q, A = raw["w2"].shape
    R = rule_size
    Tm1 = token_size - 1
    off_rule, off_tok, off_ptr, off_gen, S = _segments(E, A)
    R_pad = _ceil_to(R, LANE)
    T_pad = _ceil_to(Tm1, LANE)

    w_act = jnp.zeros((H, S), jnp.float32)
    w_act = w_act.at[:, off_rule:off_rule + E].set(raw["w_rule"])
    w_act = w_act.at[:, off_tok:off_tok + E].set(raw["w_tok_h"])
    w_act = w_act.at[:, off_ptr:off_ptr + A].set(raw["w1_h"])
    w_act = w_act.at[:, off_gen:off_gen + 3].set(raw["w_gen"])

    w_ctx = jnp.zeros((Q, S), jnp.float32)
    w_ctx = w_ctx.at[:, off_tok:off_tok + E].set(raw["w_tok_q"])
    w_ctx = w_ctx.at[:, off_ptr:off_ptr + A].set(raw["w1_q"])

    b_fused = jnp.zeros((1, S), jnp.float32)
    b_fused = b_fused.at[0, off_rule:off_rule + E].set(raw["b_rule"])
    b_fused = b_fused.at[0, off_tok:off_tok + E].set(raw["b_tok"])
    b_fused = b_fused.at[0, off_gen:off_gen + 3].set(raw["b_gen"])

    # Embedding-inverse matrices padded to lane-dense widths; the padded logit
    # columns get a -1e9 bias so the padded softmax entries are exactly 0.
    rule_embT = jnp.zeros((E, R_pad), jnp.float32).at[:, :R].set(raw["rule_embT"])
    rule_invb = jnp.full((1, R_pad), NEG, jnp.float32).at[:, :R].set(0.0)
    tok_embT = jnp.zeros((E, T_pad), jnp.float32).at[:, :Tm1].set(raw["tok_embT"])
    tok_invb = jnp.full((1, T_pad), NEG, jnp.float32).at[:, :Tm1].set(0.0)

    return {
        "w_act": w_act, "w_ctx": w_ctx, "b_fused": b_fused,
        "rule_embT": rule_embT, "rule_invb": rule_invb,
        "tok_embT": tok_embT, "tok_invb": tok_invb,
        "w2": raw["w2"].astype(jnp.float32), "v": raw["v"].astype(jnp.float32),
    }


# ----------------------------------------------------------------------------
# Forward pass
# ----------------------------------------------------------------------------
def predictor_forward(params, reference_features, reference_mask,
                      action_features, action_contexts,
                      *, rule_size, token_size, num_chunks=2):
    L_nl, B, Q = reference_features.shape
    L_ast, _, H = action_features.shape
    E = params["rule_embT"].shape[0]
    A = params["w2"].shape[1]
    R = rule_size
    Tm1 = token_size - 1
    off_rule, off_tok, off_ptr, off_gen, S = _segments(E, A)
    R_pad = params["rule_embT"].shape[1]
    T_pad = params["tok_embT"].shape[1]
    L_pad = _ceil_to(L_nl, LANE)

    NC = max(1, min(num_chunks, B))          # >=2 chunks -> both v7x TensorCores busy
    B_blk = _ceil_to(B, NC) // NC
    B_pad = NC * B_blk
    M = B_blk * L_ast

    f32 = jnp.float32
    mm = MATMUL_DTYPE

    # --- host-side layout: batch-major + zero padding to the chunked batch ---
    def to_bm(x):                            # (L, B, D) -> (B_pad, L, D)
        x = jnp.transpose(x, (1, 0, 2)).astype(f32)
        return jnp.pad(x, ((0, B_pad - B), (0, 0), (0, 0)))

    act_b = to_bm(action_features)                                   # (B_pad, L_ast, H)
    ctx_b = to_bm(action_contexts)                                   # (B_pad, L_ast, Q)
    ref_b = jnp.transpose(reference_features, (1, 0, 2)).astype(f32)
    ref_b = jnp.pad(ref_b, ((0, B_pad - B), (0, L_pad - L_nl), (0, 0)))  # (B_pad, L_pad, Q)
    # prefix mask -> lengths (scalar prefetch, SMEM); padded batch rows get 0
    lens = jnp.sum(reference_mask.astype(f32) > 0, axis=0).astype(jnp.int32)
    lens = jnp.pad(lens, (0, B_pad - B))                             # (B_pad,)

    def softmax(x):
        m = jnp.max(x, axis=-1, keepdims=True)
        e = jnp.exp(x - m)
        return e * pl.reciprocal(jnp.sum(e, axis=-1, keepdims=True), approx=False)

    def kernel(lens_ref, act_ref, ctx_ref, refq_ref,
               w_act_ref, w_ctx_ref, b_fused_ref,
               rule_embT_ref, rule_invb_ref, tok_embT_ref, tok_invb_ref,
               w2_ref, v_ref,
               rule_out_ref, tok_out_ref, ref_out_ref):
        # ---- fused first stage: 2 wide matmuls instead of 6 narrow ones ----
        act2d = act_ref[...].reshape(M, H).astype(mm)
        ctx2d = ctx_ref[...].reshape(M, Q).astype(mm)
        stage = (jnp.dot(act2d, w_act_ref[...].astype(mm), preferred_element_type=f32)
                 + jnp.dot(ctx2d, w_ctx_ref[...].astype(mm), preferred_element_type=f32)
                 + b_fused_ref[...])                                 # (M, S)

        # ---- rule head ----
        rule_h = jnp.tanh(stage[:, off_rule:off_rule + E]).astype(mm)
        rule_p = softmax(jnp.dot(rule_h, rule_embT_ref[...].astype(mm),
                                 preferred_element_type=f32) + rule_invb_ref[...])
        # ---- token head (dc = [act; ctx] realized as split matmuls) ----
        tok_h = jnp.tanh(stage[:, off_tok:off_tok + E]).astype(mm)
        tok_p = softmax(jnp.dot(tok_h, tok_embT_ref[...].astype(mm),
                                preferred_element_type=f32) + tok_invb_ref[...])
        # ---- generate gate ----
        gen = softmax(stage[:, off_gen:off_gen + 3])                 # (M, 3)

        rule_out_ref[...] = (gen[:, 0:1] * rule_p).reshape(B_blk, L_ast, R_pad)
        tok_out_ref[...] = (gen[:, 1:2] * tok_p).reshape(B_blk, L_ast, T_pad)

        # ---- pointer net over the (lane-padded) reference sequence ----
        kt2d = stage[:, off_ptr:off_ptr + A]                         # (M, A)
        base = pl.program_id(0) * B_blk
        for b in range(B_blk):                                       # static unroll
            kt_b = kt2d[b * L_ast:(b + 1) * L_ast, :]                # (L_ast, A)
            vt_b = jnp.dot(refq_ref[b].astype(mm), w2_ref[...].astype(mm),
                           preferred_element_type=f32)               # (L_pad, A)
            trans = jnp.tanh(kt_b[:, None, :] + vt_b[None, :, :])    # (L_ast, L_pad, A)
            # TODO(synk): at production L_nl move this A-reduce off the lane axis
            # (sublane/MXU reduce) per the perf review; at A=32 it is a minor cost.
            scores = jnp.sum(trans * v_ref[...], axis=-1)            # (L_ast, L_pad)
            valid = (lax.broadcasted_iota(jnp.int32, (L_ast, L_pad), 1)
                     < lens_ref[base + b])
            p = softmax(jnp.where(valid, scores, jnp.float32(NEG))) * valid.astype(f32)
            ref_out_ref[b] = gen[b * L_ast:(b + 1) * L_ast, 2:3] * p

    def chunk_spec(shape):
        return pl.BlockSpec((B_blk,) + shape, lambda c, *_: (c,) + (0,) * len(shape))

    def full_spec(shape):
        return pl.BlockSpec(shape, lambda c, *_: (0,) * len(shape))

    grid_spec = pltpu.PrefetchScalarGridSpec(
        num_scalar_prefetch=1,
        grid=(NC,),
        in_specs=[
            chunk_spec((L_ast, H)), chunk_spec((L_ast, Q)), chunk_spec((L_pad, Q)),
            full_spec((H, S)), full_spec((Q, S)), full_spec((1, S)),
            full_spec((E, R_pad)), full_spec((1, R_pad)),
            full_spec((E, T_pad)), full_spec((1, T_pad)),
            full_spec((Q, A)), full_spec((1, A)),
        ],
        out_specs=[
            chunk_spec((L_ast, R_pad)),
            chunk_spec((L_ast, T_pad)),
            chunk_spec((L_ast, L_pad)),
        ],
    )

    rule_b, tok_b, refo_b = pl.pallas_call(
        kernel,
        grid_spec=grid_spec,
        out_shape=[
            jax.ShapeDtypeStruct((B_pad, L_ast, R_pad), jnp.float32),
            jax.ShapeDtypeStruct((B_pad, L_ast, T_pad), jnp.float32),
            jax.ShapeDtypeStruct((B_pad, L_ast, L_pad), jnp.float32),
        ],
        # TODO(synk): for production vocab sizes raise vmem_limit_bytes (and/or
        # single-buffer the constant weight specs) so the double-buffered
        # rule/token embedding tables fit v7x's 64 MiB VMEM.
        compiler_params=pltpu.CompilerParams(dimension_semantics=("parallel",)),
    )(lens, act_b, ctx_b, ref_b,
      params["w_act"], params["w_ctx"], params["b_fused"],
      params["rule_embT"], params["rule_invb"],
      params["tok_embT"], params["tok_invb"],
      params["w2"], params["v"])

    # slice away padding and return PyTorch (L_ast, B, D) layout (training-mode)
    rule_probs = jnp.transpose(rule_b[:B, :, :R], (1, 0, 2))
    token_probs = jnp.transpose(tok_b[:B, :, :Tm1], (1, 0, 2))
    reference_probs = jnp.transpose(refo_b[:B, :, :L_nl], (1, 0, 2))
    # TODO(synk): PaddedSequenceWithMask wrapper / eval-mode [-1] slicing is
    # host-side plumbing; kernel returns the full padded sequences.
    return rule_probs, token_probs, reference_probs


# ----------------------------------------------------------------------------
# Deterministic torch-equivalent raw parameters
# ----------------------------------------------------------------------------
def _xavier_uniform(key, shape):          # torch Linear weight shape = (fan_out, fan_in)
    fan_out, fan_in = shape
    bound = float(np.sqrt(6.0 / (fan_in + fan_out)))
    return jax.random.uniform(key, shape, jnp.float32, -bound, bound)


def init_raw_params(key, H, Q, E, A, R, T):
    ks = jax.random.split(key, 8)
    w_rule_t = _xavier_uniform(ks[0], (E, H))          # _l_rule.weight
    w_token_t = _xavier_uniform(ks[1], (E, H + Q))     # _l_token.weight
    w_gen_t = _xavier_uniform(ks[2], (3, H))           # _l_generate.weight
    w1_t = _xavier_uniform(ks[3], (A, H + Q))          # PointerNet.w1.weight
    w2_t = _xavier_uniform(ks[4], (A, Q))              # PointerNet.w2.weight
    v_t = _xavier_uniform(ks[5], (1, A))               # PointerNet.v.weight
    rule_emb = jax.random.normal(ks[6], (R, E), jnp.float32)   # rule_embed.weight
    tok_emb = jax.random.normal(ks[7], (T, E), jnp.float32)    # token_embed.weight
    return {
        "w_rule": w_rule_t.T, "b_rule": jnp.zeros((E,), jnp.float32),
        "rule_embT": rule_emb.T,
        "w_tok_h": w_token_t[:, :H].T, "w_tok_q": w_token_t[:, H:].T,
        "b_tok": jnp.zeros((E,), jnp.float32),
        # token logits[:-1] are softmaxed in torch; dropping the last embedding
        # row before the matmul is mathematically identical.
        "tok_embT": tok_emb.T[:, :T - 1],
        "w_gen": w_gen_t.T, "b_gen": jnp.zeros((3,), jnp.float32),
        "w1_h": w1_t[:, :H].T, "w1_q": w1_t[:, H:].T,
        "w2": w2_t.T, "v": v_t,
    }


# ----------------------------------------------------------------------------
# Pure-JAX reference (mirrors the torch forward) for correctness checking
# ----------------------------------------------------------------------------
def predictor_reference(raw, ref_feat, ref_mask, act, ctx):
    sm = lambda x: jax.nn.softmax(x, axis=-1)
    rule_h = jnp.tanh(act @ raw["w_rule"] + raw["b_rule"])
    rule_p = sm(rule_h @ raw["rule_embT"])
    tok_h = jnp.tanh(act @ raw["w_tok_h"] + ctx @ raw["w_tok_q"] + raw["b_tok"])
    tok_p = sm(tok_h @ raw["tok_embT"])
    kt = act @ raw["w1_h"] + ctx @ raw["w1_q"]               # (L_ast, B, A)
    vt = ref_feat @ raw["w2"]                                # (L_nl, B, A)
    trans = jnp.tanh(kt[:, None, :, :] + vt[None, :, :, :])  # (L_ast, L_nl, B, A)
    scores = jnp.sum(trans * raw["v"][0], axis=-1)           # (L_ast, L_nl, B)
    scores = jnp.transpose(scores, (0, 2, 1))                # (L_ast, B, L_nl)
    m = jnp.transpose(ref_mask, (1, 0))[None].astype(jnp.float32)   # (1, B, L_nl)
    ref_p = sm(jnp.where(m > 0, scores, NEG)) * m
    gen = sm(act @ raw["w_gen"] + raw["b_gen"])              # (L_ast, B, 3)
    return (gen[..., 0:1] * rule_p, gen[..., 1:2] * tok_p, gen[..., 2:3] * ref_p)


if __name__ == "__main__":
    L_nl, L_ast, B = 8, 8, 2
    H, Q, E, A, R, T = 32, 16, 32, 32, 16, 12   # hidden, query, embed, att_hidden, rules, tokens

    key = jax.random.PRNGKey(0)
    kp, k1, k2, k3 = jax.random.split(key, 4)
    raw = init_raw_params(kp, H, Q, E, A, R, T)
    packed = pack_params(raw, rule_size=R, token_size=T)

    reference_features = jax.random.normal(k1, (L_nl, B, Q), jnp.float32)
    action_features = jax.random.normal(k2, (L_ast, B, H), jnp.float32)
    action_contexts = jax.random.normal(k3, (L_ast, B, Q), jnp.float32)
    lens = jnp.array([L_nl, 5])
    reference_mask = (jnp.arange(L_nl)[:, None] < lens[None, :]).astype(jnp.float32)  # (L_nl, B)

    outs = predictor_forward(packed, reference_features, reference_mask,
                             action_features, action_contexts,
                             rule_size=R, token_size=T)
    outs = jax.block_until_ready(outs)

    refs = predictor_reference(raw, reference_features, reference_mask,
                               action_features, action_contexts)
    for o, r in zip(outs, refs):
        np.testing.assert_allclose(np.asarray(o), np.asarray(r), rtol=2e-5, atol=2e-5)

    print("KERNEL_OK")
</pallas_src>

<mosaic_0001>
module attributes {stable_mosaic.version = 11 : i64} {
  func.func @kernel(%arg0: i32, %arg1: memref<2xi32, #tpu.memory_space<smem>>, %arg2: memref<1x8x32xf32, #tpu.memory_space<vmem>>, %arg3: memref<1x8x16xf32, #tpu.memory_space<vmem>>, %arg4: memref<1x128x16xf32, #tpu.memory_space<vmem>>, %arg5: memref<32x512xf32, #tpu.memory_space<vmem>>, %arg6: memref<16x512xf32, #tpu.memory_space<vmem>>, %arg7: memref<1x512xf32, #tpu.memory_space<vmem>>, %arg8: memref<32x128xf32, #tpu.memory_space<vmem>>, %arg9: memref<1x128xf32, #tpu.memory_space<vmem>>, %arg10: memref<32x128xf32, #tpu.memory_space<vmem>>, %arg11: memref<1x128xf32, #tpu.memory_space<vmem>>, %arg12: memref<16x32xf32, #tpu.memory_space<vmem>>, %arg13: memref<1x32xf32, #tpu.memory_space<vmem>>, %arg14: memref<1x8x128xf32, #tpu.memory_space<vmem>>, %arg15: memref<1x8x128xf32, #tpu.memory_space<vmem>>, %arg16: memref<1x8x128xf32, #tpu.memory_space<vmem>>) attributes {dimension_semantics = [#tpu.dimension_semantics<parallel>], iteration_bounds = array<i64: 2>, scalar_prefetch = 1 : i64, scratch_operands = 0 : i64, tpu.core_type = #tpu.core_type<tc>, window_params = [{transform_indices = @transform_0, window_bounds = array<i64: 1, 8, 32>}, {transform_indices = @transform_1, window_bounds = array<i64: 1, 8, 16>}, {transform_indices = @transform_2, window_bounds = array<i64: 1, 128, 16>}, {pipeline_mode = #tpu.pipeline_mode<synchronous>, transform_indices = @transform_3, window_bounds = array<i64: 32, 512>}, {pipeline_mode = #tpu.pipeline_mode<synchronous>, transform_indices = @transform_4, window_bounds = array<i64: 16, 512>}, {pipeline_mode = #tpu.pipeline_mode<synchronous>, transform_indices = @transform_5, window_bounds = array<i64: 1, 512>}, {pipeline_mode = #tpu.pipeline_mode<synchronous>, transform_indices = @transform_6, window_bounds = array<i64: 32, 128>}, {pipeline_mode = #tpu.pipeline_mode<synchronous>, transform_indices = @transform_7, window_bounds = array<i64: 1, 128>}, {pipeline_mode = #tpu.pipeline_mode<synchronous>, transform_indices = @transform_8, window_bounds = array<i64: 32, 128>}, {pipeline_mode = #tpu.pipeline_mode<synchronous>, transform_indices = @transform_9, window_bounds = array<i64: 1, 128>}, {pipeline_mode = #tpu.pipeline_mode<synchronous>, transform_indices = @transform_10, window_bounds = array<i64: 16, 32>}, {pipeline_mode = #tpu.pipeline_mode<synchronous>, transform_indices = @transform_11, window_bounds = array<i64: 1, 32>}, {transform_indices = @transform_12, window_bounds = array<i64: 1, 8, 128>}, {transform_indices = @transform_13, window_bounds = array<i64: 1, 8, 128>}, {transform_indices = @transform_14, window_bounds = array<i64: 1, 8, 128>}]} {
    %c0 = arith.constant 0 : index
    %c0_0 = arith.constant 0 : index
    %c0_1 = arith.constant 0 : index
    %0 = vector.load %arg2[%c0, %c0_0, %c0_1] : memref<1x8x32xf32, #tpu.memory_space<vmem>>, vector<1x8x32xf32>
    %1 = vector.shape_cast %0 : vector<1x8x32xf32> to vector<8x32xf32>
    %c0_2 = arith.constant 0 : index
    %c0_3 = arith.constant 0 : index
    %c0_4 = arith.constant 0 : index
    %2 = vector.load %arg3[%c0_2, %c0_3, %c0_4] : memref<1x8x16xf32, #tpu.memory_space<vmem>>, vector<1x8x16xf32>
    %3 = vector.shape_cast %2 : vector<1x8x16xf32> to vector<8x16xf32>
    %c0_5 = arith.constant 0 : index
    %c0_6 = arith.constant 0 : index
    %4 = vector.load %arg5[%c0_5, %c0_6] : memref<32x512xf32, #tpu.memory_space<vmem>>, vector<32x512xf32>
    %cst = arith.constant dense<0.000000e+00> : vector<8x512xf32>
    %5 = tpu.matmul %1, %4, %cst {dimension_numbers = #tpu.dot_dimension_numbers<[1], [0], [0], [1], [0, 0, 1, 1], [], []>} : vector<8x32xf32>, vector<32x512xf32>, vector<8x512xf32> -> vector<8x512xf32>
    %c0_7 = arith.constant 0 : index
    %c0_8 = arith.constant 0 : index
    %6 = vector.load %arg6[%c0_7, %c0_8] : memref<16x512xf32, #tpu.memory_space<vmem>>, vector<16x512xf32>
    %cst_9 = arith.constant dense<0.000000e+00> : vector<8x512xf32>
    %7 = tpu.matmul %3, %6, %cst_9 {dimension_numbers = #tpu.dot_dimension_numbers<[1], [0], [0], [1], [0, 0, 1, 1], [], []>} : vector<8x16xf32>, vector<16x512xf32>, vector<8x512xf32> -> vector<8x512xf32>
    %8 = arith.addf %5, %7 : vector<8x512xf32>
    %c0_10 = arith.constant 0 : index
    %c0_11 = arith.constant 0 : index
    %9 = vector.load %arg7[%c0_10, %c0_11] : memref<1x512xf32, #tpu.memory_space<vmem>>, vector<1x512xf32>
    %10 = vector.broadcast %9 : vector<1x512xf32> to vector<8x512xf32>
    %11 = arith.addf %8, %10 : vector<8x512xf32>
    %12 = vector.extract_strided_slice %11 {offsets = [0, 0], sizes = [8, 32], strides = [1, 1]} : vector<8x512xf32> to vector<8x32xf32>
    %13 = math.tanh %12 : vector<8x32xf32>
    %c0_12 = arith.constant 0 : index
    %c0_13 = arith.constant 0 : index
    %14 = vector.load %arg8[%c0_12, %c0_13] : memref<32x128xf32, #tpu.memory_space<vmem>>, vector<32x128xf32>
    %cst_14 = arith.constant dense<0.000000e+00> : vector<8x128xf32>
    %15 = tpu.matmul %13, %14, %cst_14 {dimension_numbers = #tpu.dot_dimension_numbers<[1], [0], [0], [1], [0, 0, 1, 1], [], []>} : vector<8x32xf32>, vector<32x128xf32>, vector<8x128xf32> -> vector<8x128xf32>
    %c0_15 = arith.constant 0 : index
    %c0_16 = arith.constant 0 : index
    %16 = vector.load %arg9[%c0_15, %c0_16] : memref<1x128xf32, #tpu.memory_space<vmem>>, vector<1x128xf32>
    %17 = vector.broadcast %16 : vector<1x128xf32> to vector<8x128xf32>
    %18 = arith.addf %15, %17 : vector<8x128xf32>
    %cst_17 = arith.constant dense<0xFF800000> : vector<8xf32>
    %19 = vector.multi_reduction <maximumf>, %18, %cst_17 [1] : vector<8x128xf32> to vector<8xf32>
    %20 = vector.shape_cast %19 : vector<8xf32> to vector<8x1xf32>
    %21 = vector.broadcast %20 : vector<8x1xf32> to vector<8x128xf32>
    %22 = arith.subf %18, %21 : vector<8x128xf32>
    %23 = math.exp %22 : vector<8x128xf32>
    %cst_18 = arith.constant dense<0.000000e+00> : vector<8xf32>
    %24 = vector.multi_reduction <add>, %23, %cst_18 [1] : vector<8x128xf32> to vector<8xf32>
    %25 = vector.shape_cast %24 : vector<8xf32> to vector<8x1xf32>
    %26 = tpu.reciprocal %25 : vector<8x1xf32> -> vector<8x1xf32>
    %27 = vector.broadcast %26 : vector<8x1xf32> to vector<8x128xf32>
    %28 = arith.mulf %23, %27 : vector<8x128xf32>
    %29 = vector.extract_strided_slice %11 {offsets = [0, 128], sizes = [8, 32], strides = [1, 1]} : vector<8x512xf32> to vector<8x32xf32>
    %30 = math.tanh %29 : vector<8x32xf32>
    %c0_19 = arith.constant 0 : index
    %c0_20 = arith.constant 0 : index
    %31 = vector.load %arg10[%c0_19, %c0_20] : memref<32x128xf32, #tpu.memory_space<vmem>>, vector<32x128xf32>
    %cst_21 = arith.constant dense<0.000000e+00> : vector<8x128xf32>
    %32 = tpu.matmul %30, %31, %cst_21 {dimension_numbers = #tpu.dot_dimension_numbers<[1], [0], [0], [1], [0, 0, 1, 1], [], []>} : vector<8x32xf32>, vector<32x128xf32>, vector<8x128xf32> -> vector<8x128xf32>
    %c0_22 = arith.constant 0 : index
    %c0_23 = arith.constant 0 : index
    %33 = vector.load %arg11[%c0_22, %c0_23] : memref<1x128xf32, #tpu.memory_space<vmem>>, vector<1x128xf32>
    %34 = vector.broadcast %33 : vector<1x128xf32> to vector<8x128xf32>
    %35 = arith.addf %32, %34 : vector<8x128xf32>
    %cst_24 = arith.constant dense<0xFF800000> : vector<8xf32>
    %36 = vector.multi_reduction <maximumf>, %35, %cst_24 [1] : vector<8x128xf32> to vector<8xf32>
    %37 = vector.shape_cast %36 : vector<8xf32> to vector<8x1xf32>
    %38 = vector.broadcast %37 : vector<8x1xf32> to vector<8x128xf32>
    %39 = arith.subf %35, %38 : vector<8x128xf32>
    %40 = math.exp %39 : vector<8x128xf32>
    %cst_25 = arith.constant dense<0.000000e+00> : vector<8xf32>
    %41 = vector.multi_reduction <add>, %40, %cst_25 [1] : vector<8x128xf32> to vector<8xf32>
    %42 = vector.shape_cast %41 : vector<8xf32> to vector<8x1xf32>
    %43 = tpu.reciprocal %42 : vector<8x1xf32> -> vector<8x1xf32>
    %44 = vector.broadcast %43 : vector<8x1xf32> to vector<8x128xf32>
    %45 = arith.mulf %40, %44 : vector<8x128xf32>
    %46 = vector.extract_strided_slice %11 {offsets = [0, 384], sizes = [8, 3], strides = [1, 1]} : vector<8x512xf32> to vector<8x3xf32>
    %cst_26 = arith.constant dense<0xFF800000> : vector<8xf32>
    %47 = vector.multi_reduction <maximumf>, %46, %cst_26 [1] : vector<8x3xf32> to vector<8xf32>
    %48 = vector.shape_cast %47 : vector<8xf32> to vector<8x1xf32>
    %49 = vector.broadcast %48 : vector<8x1xf32> to vector<8x3xf32>
    %50 = arith.subf %46, %49 : vector<8x3xf32>
    %51 = math.exp %50 : vector<8x3xf32>
    %cst_27 = arith.constant dense<0.000000e+00> : vector<8xf32>
    %52 = vector.multi_reduction <add>, %51, %cst_27 [1] : vector<8x3xf32> to vector<8xf32>
    %53 = vector.shape_cast %52 : vector<8xf32> to vector<8x1xf32>
    %54 = tpu.reciprocal %53 : vector<8x1xf32> -> vector<8x1xf32>
    %55 = vector.broadcast %54 : vector<8x1xf32> to vector<8x3xf32>
    %56 = arith.mulf %51, %55 : vector<8x3xf32>
    %57 = vector.extract_strided_slice %56 {offsets = [0, 0], sizes = [8, 1], strides = [1, 1]} : vector<8x3xf32> to vector<8x1xf32>
    %58 = vector.broadcast %57 : vector<8x1xf32> to vector<8x128xf32>
    %59 = arith.mulf %58, %28 : vector<8x128xf32>
    %60 = vector.shape_cast %59 : vector<8x128xf32> to vector<1x8x128xf32>
    %c0_28 = arith.constant 0 : index
    %c0_29 = arith.constant 0 : index
    %c0_30 = arith.constant 0 : index
    %61 = vector.load %arg14[%c0_28, %c0_29, %c0_30] : memref<1x8x128xf32, #tpu.memory_space<vmem>>, vector<1x8x128xf32>
    tpu.vector_store %arg14[%c0_28, %c0_29, %c0_30], %60 {strides = array<i32>} : memref<1x8x128xf32, #tpu.memory_space<vmem>>, vector<1x8x128xf32>,
    %62 = vector.extract_strided_slice %56 {offsets = [0, 1], sizes = [8, 1], strides = [1, 1]} : vector<8x3xf32> to vector<8x1xf32>
    %63 = vector.broadcast %62 : vector<8x1xf32> to vector<8x128xf32>
    %64 = arith.mulf %63, %45 : vector<8x128xf32>
    %65 = vector.shape_cast %64 : vector<8x128xf32> to vector<1x8x128xf32>
    %c0_31 = arith.constant 0 : index
    %c0_32 = arith.constant 0 : index
    %c0_33 = arith.constant 0 : index
    %66 = vector.load %arg15[%c0_31, %c0_32, %c0_33] : memref<1x8x128xf32, #tpu.memory_space<vmem>>, vector<1x8x128xf32>
    tpu.vector_store %arg15[%c0_31, %c0_32, %c0_33], %65 {strides = array<i32>} : memref<1x8x128xf32, #tpu.memory_space<vmem>>, vector<1x8x128xf32>,
    %67 = vector.extract_strided_slice %11 {offsets = [0, 256], sizes = [8, 32], strides = [1, 1]} : vector<8x512xf32> to vector<8x32xf32>
    %c1_i32 = arith.constant 1 : i32
    %68 = arith.muli %arg0, %c1_i32 : i32
    %c0_34 = arith.constant 0 : index
    %c0_35 = arith.constant 0 : index
    %c0_36 = arith.constant 0 : index
    %69 = vector.load %arg4[%c0_34, %c0_35, %c0_36] : memref<1x128x16xf32, #tpu.memory_space<vmem>>, vector<1x128x16xf32>
    %70 = vector.shape_cast %69 : vector<1x128x16xf32> to vector<128x16xf32>
    %c0_37 = arith.constant 0 : index
    %c0_38 = arith.constant 0 : index
    %71 = vector.load %arg12[%c0_37, %c0_38] : memref<16x32xf32, #tpu.memory_space<vmem>>, vector<16x32xf32>
    %cst_39 = arith.constant dense<0.000000e+00> : vector<128x32xf32>
    %72 = tpu.matmul %70, %71, %cst_39 {dimension_numbers = #tpu.dot_dimension_numbers<[1], [0], [0], [1], [0, 0, 1, 1], [], []>} : vector<128x16xf32>, vector<16x32xf32>, vector<128x32xf32> -> vector<128x32xf32>
    %73 = vector.shape_cast %67 : vector<8x32xf32> to vector<8x1x32xf32>
    %74 = vector.shape_cast %72 : vector<128x32xf32> to vector<1x128x32xf32>
    %75 = vector.broadcast %73 : vector<8x1x32xf32> to vector<8x128x32xf32>
    %76 = vector.broadcast %74 : vector<1x128x32xf32> to vector<8x128x32xf32>
    %77 = arith.addf %75, %76 : vector<8x128x32xf32>
    %78 = math.tanh %77 : vector<8x128x32xf32>
    %c0_40 = arith.constant 0 : index
    %c0_41 = arith.constant 0 : index
    %79 = vector.load %arg13[%c0_40, %c0_41] : memref<1x32xf32, #tpu.memory_space<vmem>>, vector<1x32xf32>
    %80 = vector.shape_cast %79 : vector<1x32xf32> to vector<1x1x32xf32>
    %81 = vector.broadcast %80 : vector<1x1x32xf32> to vector<8x128x32xf32>
    %82 = arith.mulf %78, %81 : vector<8x128x32xf32>
    %cst_42 = arith.constant dense<0.000000e+00> : vector<8x128xf32>
    %83 = vector.multi_reduction <add>, %82, %cst_42 [2] : vector<8x128x32xf32> to vector<8x128xf32>
    %84 = tpu.iota {dimensions = array<i32: 1>} : vector<8x128xi32>
    %c0_i32 = arith.constant 0 : i32
    %85 = arith.addi %68, %c0_i32 : i32
    %86 = arith.index_cast %85 : i32 to index
    %87 = memref.load %arg1[%86] : memref<2xi32, #tpu.memory_space<smem>>
    %88 = vector.broadcast %87 : i32 to vector<8x128xi32>
    %89 = arith.cmpi slt, %84, %88 : vector<8x128xi32>
    %cst_43 = arith.constant -1.000000e+09 : f32
    %90 = vector.broadcast %cst_43 : f32 to vector<8x128xf32>
    %91 = arith.select %89, %83, %90 : vector<8x128xi1>, vector<8x128xf32>
    %cst_44 = arith.constant dense<0xFF800000> : vector<8xf32>
    %92 = vector.multi_reduction <maximumf>, %91, %cst_44 [1] : vector<8x128xf32> to vector<8xf32>
    %93 = vector.shape_cast %92 : vector<8xf32> to vector<8x1xf32>
    %94 = vector.broadcast %93 : vector<8x1xf32> to vector<8x128xf32>
    %95 = arith.subf %91, %94 : vector<8x128xf32>
    %96 = math.exp %95 : vector<8x128xf32>
    %cst_45 = arith.constant dense<0.000000e+00> : vector<8xf32>
    %97 = vector.multi_reduction <add>, %96, %cst_45 [1] : vector<8x128xf32> to vector<8xf32>
    %98 = vector.shape_cast %97 : vector<8xf32> to vector<8x1xf32>
    %99 = tpu.reciprocal %98 : vector<8x1xf32> -> vector<8x1xf32>
    %100 = vector.broadcast %99 : vector<8x1xf32> to vector<8x128xf32>
    %101 = arith.mulf %96, %100 : vector<8x128xf32>
    %102 = arith.extui %89 : vector<8x128xi1> to vector<8x128xi32>
    %103 = arith.sitofp %102 : vector<8x128xi32> to vector<8x128xf32>
    %104 = arith.mulf %101, %103 : vector<8x128xf32>
    %105 = vector.extract_strided_slice %56 {offsets = [0, 2], sizes = [8, 1], strides = [1, 1]} : vector<8x3xf32> to vector<8x1xf32>
    %106 = vector.broadcast %105 : vector<8x1xf32> to vector<8x128xf32>
    %107 = arith.mulf %106, %104 : vector<8x128xf32>
    %c0_46 = arith.constant 0 : index
    %c0_47 = arith.constant 0 : index
    %c0_48 = arith.constant 0 : index
    %108 = vector.load %arg16[%c0_46, %c0_47, %c0_48] : memref<1x8x128xf32, #tpu.memory_space<vmem>>, vector<1x8x128xf32>
    %109 = vector.shape_cast %108 : vector<1x8x128xf32> to vector<8x128xf32>
    %110 = vector.shape_cast %107 : vector<8x128xf32> to vector<1x8x128xf32>
    tpu.vector_store %arg16[%c0_46, %c0_47, %c0_48], %110 {strides = array<i32>} : memref<1x8x128xf32, #tpu.memory_space<vmem>>, vector<1x8x128xf32>,
    return
  }
  func.func @transform_0(%arg0: i32, %arg1: memref<2xi32, #tpu.memory_space<smem>>) -> (i32, i32, i32) {
    %c0_i32 = arith.constant 0 : i32
    %c0_i32_0 = arith.constant 0 : i32
    %c0_i32_1 = arith.constant 0 : i32
    return %arg0, %c0_i32, %c0_i32_0 : i32, i32, i32
  }
  func.func @transform_1(%arg0: i32, %arg1: memref<2xi32, #tpu.memory_space<smem>>) -> (i32, i32, i32) {
    %c0_i32 = arith.constant 0 : i32
    %c0_i32_0 = arith.constant 0 : i32
    %c0_i32_1 = arith.constant 0 : i32
    return %arg0, %c0_i32, %c0_i32_0 : i32, i32, i32
  }
  func.func @transform_2(%arg0: i32, %arg1: memref<2xi32, #tpu.memory_space<smem>>) -> (i32, i32, i32) {
    %c0_i32 = arith.constant 0 : i32
    %c0_i32_0 = arith.constant 0 : i32
    %c0_i32_1 = arith.constant 0 : i32
    return %arg0, %c0_i32, %c0_i32_0 : i32, i32, i32
  }
  func.func @transform_3(%arg0: i32, %arg1: memref<2xi32, #tpu.memory_space<smem>>) -> (i32, i32) {
    %c0_i32 = arith.constant 0 : i32
    %c0_i32_0 = arith.constant 0 : i32
    %c0_i32_1 = arith.constant 0 : i32
    return %c0_i32, %c0_i32_0 : i32, i32
  }
  func.func @transform_4(%arg0: i32, %arg1: memref<2xi32, #tpu.memory_space<smem>>) -> (i32, i32) {
    %c0_i32 = arith.constant 0 : i32
    %c0_i32_0 = arith.constant 0 : i32
    %c0_i32_1 = arith.constant 0 : i32
    return %c0_i32, %c0_i32_0 : i32, i32
  }
  func.func @transform_5(%arg0: i32, %arg1: memref<2xi32, #tpu.memory_space<smem>>) -> (i32, i32) {
    %c0_i32 = arith.constant 0 : i32
    %c0_i32_0 = arith.constant 0 : i32
    %c0_i32_1 = arith.constant 0 : i32
    return %c0_i32, %c0_i32_0 : i32, i32
  }
  func.func @transform_6(%arg0: i32, %arg1: memref<2xi32, #tpu.memory_space<smem>>) -> (i32, i32) {
    %c0_i32 = arith.constant 0 : i32
    %c0_i32_0 = arith.constant 0 : i32
    %c0_i32_1 = arith.constant 0 : i32
    return %c0_i32, %c0_i32_0 : i32, i32
  }
  func.func @transform_7(%arg0: i32, %arg1: memref<2xi32, #tpu.memory_space<smem>>) -> (i32, i32) {
    %c0_i32 = arith.constant 0 : i32
    %c0_i32_0 = arith.constant 0 : i32
    %c0_i32_1 = arith.constant 0 : i32
    return %c0_i32, %c0_i32_0 : i32, i32
  }
  func.func @transform_8(%arg0: i32, %arg1: memref<2xi32, #tpu.memory_space<smem>>) -> (i32, i32) {
    %c0_i32 = arith.constant 0 : i32
    %c0_i32_0 = arith.constant 0 : i32
    %c0_i32_1 = arith.constant 0 : i32
    return %c0_i32, %c0_i32_0 : i32, i32
  }
  func.func @transform_9(%arg0: i32, %arg1: memref<2xi32, #tpu.memory_space<smem>>) -> (i32, i32) {
    %c0_i32 = arith.constant 0 : i32
    %c0_i32_0 = arith.constant 0 : i32
    %c0_i32_1 = arith.constant 0 : i32
    return %c0_i32, %c0_i32_0 : i32, i32
  }
  func.func @transform_10(%arg0: i32, %arg1: memref<2xi32, #tpu.memory_space<smem>>) -> (i32, i32) {
    %c0_i32 = arith.constant 0 : i32
    %c0_i32_0 = arith.constant 0 : i32
    %c0_i32_1 = arith.constant 0 : i32
    return %c0_i32, %c0_i32_0 : i32, i32
  }
  func.func @transform_11(%arg0: i32, %arg1: memref<2xi32, #tpu.memory_space<smem>>) -> (i32, i32) {
    %c0_i32 = arith.constant 0 : i32
    %c0_i32_0 = arith.constant 0 : i32
    %c0_i32_1 = arith.constant 0 : i32
    return %c0_i32, %c0_i32_0 : i32, i32
  }
  func.func @transform_12(%arg0: i32, %arg1: memref<2xi32, #tpu.memory_space<smem>>) -> (i32, i32, i32) {
    %c0_i32 = arith.constant 0 : i32
    %c0_i32_0 = arith.constant 0 : i32
    %c0_i32_1 = arith.constant 0 : i32
    return %arg0, %c0_i32, %c0_i32_0 : i32, i32, i32
  }
  func.func @transform_13(%arg0: i32, %arg1: memref<2xi32, #tpu.memory_space<smem>>) -> (i32, i32, i32) {
    %c0_i32 = arith.constant 0 : i32
    %c0_i32_0 = arith.constant 0 : i32
    %c0_i32_1 = arith.constant 0 : i32
    return %arg0, %c0_i32, %c0_i32_0 : i32, i32, i32
  }
  func.func @transform_14(%arg0: i32, %arg1: memref<2xi32, #tpu.memory_space<smem>>) -> (i32, i32, i32) {
    %c0_i32 = arith.constant 0 : i32
    %c0_i32_0 = arith.constant 0 : i32
    %c0_i32_1 = arith.constant 0 : i32
    return %arg0, %c0_i32, %c0_i32_0 : i32, i32, i32
  }
}

</mosaic_0001>

<bundles_post_ra>
// kernel: tpu_custom_call.1
= control target key start
LH: loop header
LB: loop body
LE: loop exit
PB: predicated region body
PF: predicated region fallthrough
CT: control target
= control target key end

     0   :  { %s5497_s0 = inlined_call_operand.hbm [shape: s32[2], index: 0, kind: input, shape index: {}]   ;;  %s5498_s1 = inlined_call_operand.vmem [shape: f32[2,8,32], index: 1, kind: input, shape index: {}]   ;;  %s5499_s2 = inlined_call_operand.vmem [shape: f32[2,8,16], index: 2, kind: input, shape index: {}]   ;;  %s5500_s3 = inlined_call_operand.vmem [shape: f32[2,128,16], index: 3, kind: input, shape index: {}]   ;;  %s5501_s4 = inlined_call_operand.vmem [shape: f32[32,512], index: 4, kind: input, shape index: {}]   ;;  %s5502_s5 = inlined_call_operand.vmem [shape: f32[16,512], index: 5, kind: input, shape index: {}]   ;;  %s5503_s6 = inlined_call_operand.vmem [shape: f32[1,512], index: 6, kind: input, shape index: {}]   ;;  %s5504_s7 = inlined_call_operand.vmem [shape: f32[32,128], index: 7, kind: input, shape index: {}]   ;;  %s5505_s8 = inlined_call_operand.vmem [shape: f32[1,128], index: 8, kind: input, shape index: {}]   ;;  %s5506_s9 = inlined_call_operand.vmem [shape: f32[32,128], index: 9, kind: input, shape index: {}]   ;;  %s5507_s10 = inlined_call_operand.vmem [shape: f32[1,128], index: 10, kind: input, shape index: {}]   ;;  %s5508_s11 = inlined_call_operand.vmem [shape: f32[16,32], index: 11, kind: input, shape index: {}]   ;;  %s5509_s12 = inlined_call_operand.vmem [shape: f32[1,32], index: 12, kind: input, shape index: {}]   ;;  %s5510_s13 = inlined_call_operand.hbm [shape: f32[2,8,128], index: 13, kind: output, shape index: {0}]   ;;  %s5511_s14 = inlined_call_operand.hbm [shape: f32[2,8,128], index: 14, kind: output, shape index: {1}]   ;;  %s5512_s15 = inlined_call_operand.hbm [shape: f32[2,8,128], index: 15, kind: output, shape index: {2}]  }
   0x1   :  { %5527 = sst [smem:[#allocation35_spill]] %s5502_s5  ;;  %s3686_s20 = scalar_lea.hbm %s5497_s0, 16 }
   0x2   :  { %p3687_p0 = scmp.ne.s32.totalorder %s5497_s0, %s3686_s20  ;;  %p3690_p1 = scmp.lt.u32.totalorder %s3686_s20, %s5497_s0 }
   0x4   :  { %p3692_p2 = pnand %p3690_p1, %p3687_p0 }
   0x6   :  { %3695 = shalt.err (!%p3692_p2)  }
   0x7   :  { %s3822_s25 = smov [#allocation3]  }
   0x8   :  { %22 = dma.hbm_to_smem %s5497_s0, 16, %s3822_s25, [#allocation2] }
   0x9   :  { %3796 = dma.done.wait [#allocation2], 16 }
   0xa   :  { %3797 = vsyncadd [#allocation2], 4294967280 }
   0xb   :  { %24 = sfence }
   0xc   :  { %25 = vsyncpa [#allocation5], 0 }
   0xd   :  { %27 = vsyncpa [#allocation5 + $0x1], 0 }
   0xe   :  { %28 = vsyncpa [#allocation7], 0 }
   0xf   :  { %30 = vsyncpa [#allocation7 + $0x1], 0  ;;  %s3925_s28 = smov 0   ;;  %s3927_s29 = smov 0  }
  0x10   :  { %s3929_s30 = smov 0   ;;  %s3931_s16 = smov 0  }
  0x11 LB: > { %5528 = sst [smem:[#allocation12_spill]] %s3808_s28  ;;  %s3946_s0 = sadd.s32 4294967295, %s3820_s16   ;;  %s3820_s16 = sphi %s3931_s16, %s5580_s16   ;;  %s3816_s30 = sphi %s3929_s30, %s5582_s30   ;;  %s3812_s29 = sphi %s3927_s29, %s5584_s29   ;;  %s3808_s28 = sphi %s3925_s28, %s5583_s28  }
  0x12   : > { %5529 = sst [smem:[#allocation13_spill]] %s3816_s30  ;;  %s5513_s17 = sadd.s32 4294967294, %s3820_s16  }
  0x13   : > { %s3950_s18 = sadd.s32 1, %s3820_s16   ;;  %s310_s19 = sadd.s32 1, %s3816_s30 }
  0x14   : > { %5530 = sst [smem:[#allocation14_spill]] %s3950_s18  ;;  %s307_s20 = ssub.s32 %s3820_s16, %s3950_s18 }
  0x15   : > { %p320_p3 = scmp.ne.s32.totalorder %s3816_s30, %s3812_s29  ;;  %p308_p4 = scmp.eq.s32.totalorder %s307_s20, 0 }
  0x16   : > { %p321_p5 = scmp.eq.s32.totalorder %s3946_s0, 1  ;;  %p326_p6 = scmp.ne.s32.totalorder %s3812_s29, %s3808_s28 }
  0x17   : > { %p327_p7 = scmp.eq.s32.totalorder %s5513_s17, 1  ;;  %p3182_p10 = scmp.ge.s32.totalorder %s3820_s16, 1 }
  0x18   : > { %s3963_s21 = scalar_select %p308_p4, %s3816_s30, %s310_s19  }
  0x19   : > { %p3965_p8 = por %p321_p5, %p320_p3  ;;  %p3969_p9 = por %p327_p7, %p326_p6 }
  0x1a   : > { %5531 = sst [smem:[#allocation15_spill]] %s3963_s21  ;;  %p446_p11 = scmp.lt.s32.totalorder %s3820_s16, 3 }
  0x1b   : > { %s5533_s23 = scalar_select %p3969_p9, 1, 0 }
  0x1c   : > { %p447_p12 = pnand %p3182_p10, %p446_p11 }
  0x1d   : > { %5534 = sst [smem:[#allocation16_spill]] %s5533_s23 }
  0x1e   : > { %450 = sbr.rel (%p447_p12) target bundleno = 1258 (0x4ea), region = 68 }
  0x25   : > { %s5535_s5 = sld [smem:[#allocation35_spill]]  ;;  %p510_p13 = scmp.lt.s32.totalorder %s3946_s0, 1  ;;  %v5519_v7 = vmov 0.0   ;;  %v526_v12 = vld [vmem:[%s5501_s4 + $0x8] sm:$0xff]  ;;  %v528_v15 = vld [vmem:[%s5501_s4 + $0x18] sm:$0xff]  ;;  %vm549_vm0 = vcmask 130048   ;;  %v843_v55 = vlaneseq }
  0x26   : > { %617 = vmatprep.mubr.f32.mxu0 %v5519_v7  ;;  %688 = vmatprep.mubr.f32.mxu1 %v5519_v7  ;;  %v530_v14 = vld [vmem:[%s5501_s4 + $0x28] sm:$0xff]  ;;  %v532_v16 = vld [vmem:[%s5501_s4 + $0x38] sm:$0xff]  ;;  %v525_v19 = vld [vmem:[%s5501_s4] sm:$0xff]  ;;  %vm695_vm1 = vcmask 261120   ;;  %v3824_v44 = vmov 0.0|0.0   ;;  %vm3825_vm2 = vmmov 0  }
  0x27   : > { %s4003_s30 = scalar_select %p510_p13, %s3946_s0, 1  ;;  %v3311_v17 = vpack.c.bf16 %v530_v14, %v526_v12  ;;  %v3319_v18 = vpack.c.bf16 %v532_v16, %v528_v15  ;;  %v529_v20 = vld [vmem:[%s5501_s4 + $0x20] sm:$0xff]  ;;  %v527_v21 = vld [vmem:[%s5501_s4 + $0x10] sm:$0xff]  ;;  %v534_v24 = vld [vmem:[%s5501_s4 + $0x48] sm:$0xff]  ;;  %v4103_v56 = vshrl.u32 %v843_v55, 7  ;;  %vm1055_vm3 = vcmask 23552  }
  0x28   : > { %v3313_v22 = vpack.c.bf16 %v529_v20, %v525_v19  ;;  %v531_v23 = vld [vmem:[%s5501_s4 + $0x30] sm:$0xff]  ;;  %v538_v25 = vld [vmem:[%s5501_s4 + $0x68] sm:$0xff]  ;;  %v536_v29 = vld [vmem:[%s5501_s4 + $0x58] sm:$0xff]  ;;  %vm2298_vm4 = vcmask 130112   ;;  %vm2305_vm5 = vcmask 195712   ;;  %vm2312_vm6 = vcmask 261312  }
  0x29   : > { %s3186_s21 = sshll.u32 %s4003_s30, 3  ;;  %v3321_v27 = vpack.c.bf16 %v531_v23, %v527_v21  ;;  %v3315_v28 = vpack.c.bf16 %v538_v25, %v534_v24  ;;  %v540_v30 = vld [vmem:[%s5501_s4 + $0x78] sm:$0xff]  ;;  %v533_v32 = vld [vmem:[%s5501_s4 + $0x40] sm:$0xff]  ;;  %v535_v34 = vld [vmem:[%s5501_s4 + $0x50] sm:$0xff]  ;;  %v4106_v57 = vsub.s32 0, %v4103_v56  ;;  %v853_v59 = vsub.s32 2, %v4103_v56 }
  0x2a   : > { %v3323_v31 = vpack.c.bf16 %v540_v30, %v536_v29  ;;  %v537_v33 = vld [vmem:[%s5501_s4 + $0x60] sm:$0xff]  ;;  %v539_v36 = vld [vmem:[%s5501_s4 + $0x70] sm:$0xff]  ;;  %s513_s23 = scalar_lea.vmem %s5498_s1, %s3186_s21  ;;  %v869_v40 = vld [vmem:[%s5504_s7 + $0x8] sm:$0xff]  ;;  %v849_v60 = vsub.s32 1, %v4103_v56  ;;  %v857_v61 = vsub.s32 3, %v4103_v56  ;;  %s3224_s28 = sshll.u32 %s4003_s30, 7 }
  0x2b   : > { %v542_v0 = vld [vmem:[%s5535_s5 + $0x8] sm:$0xff]  ;;  %v544_v2 = vld [vmem:[%s5535_s5 + $0x18] sm:$0xff]  ;;  %v541_v5 = vld [vmem:[%s5535_s5] sm:$0xff]  ;;  %v3317_v35 = vpack.c.bf16 %v537_v33, %v533_v32  ;;  %v3325_v37 = vpack.c.bf16 %v539_v36, %v535_v34  ;;  %s4122_s17 = scalar_lea.vmem %s5500_s3, %s3224_s28  ;;  %vm2319_vm7 = vcmask 326912   ;;  %vm2326_vm8 = vcmask 392512   ;;  %s5346_s26 = sld [smem:[#allocation3 + %s3946_s0]] }
  0x2c   : > { %v546_v1 = vld [vmem:[%s5535_s5 + $0x28] sm:$0xff]  ;;  %v548_v4 = vld [vmem:[%s5535_s5 + $0x38] sm:$0xff]  ;;  %v545_v6 = vld [vmem:[%s5535_s5 + $0x20] sm:$0xff]  ;;  %vm2333_vm9 = vcmask 458112   ;;  %vm2340_vm10 = vcmask 523712   ;;  %vm2347_vm11 = vcmask 589312  }
  0x2d   : > { %v3303_v3 = vpack.c.bf16 %v546_v1, %v542_v0  ;;  %v3307_v8 = vpack.c.bf16 %v548_v4, %v544_v2  ;;  %v3305_v9 = vpack.c.bf16 %v545_v6, %v541_v5  ;;  %v543_v10 = vld [vmem:[%s5535_s5 + $0x10] sm:$0xff]  ;;  %v523_v38 = vld [vmem:[%s513_s23] sm:$0xff]  ;;  %v963_v43 = vld [vmem:[%s5506_s9 + $0x8] sm:$0xff]  ;;  %vm2354_vm12 = vcmask 654912   ;;  %s5525_s28 = sand.u32 1, %s3812_s29   ;;  %s2990_s30 = sand.u32 1, %s3946_s0  }
  0x2e   : > { %v547_v11 = vld [vmem:[%s5535_s5 + $0x30] sm:$0xff]  ;;  %s517_s5 = scalar_lea.vmem %s5499_s2, %s3186_s21  ;;  %v868_v39 = vld [vmem:[%s5504_s7] sm:$0xff]  ;;  %v871_v47 = vld [vmem:[%s5504_s7 + $0x18] sm:$0xff]  ;;  %vm2361_vm13 = vcmask 720512   ;;  %vm2368_vm14 = vcmask 786112   ;;  %vm2375_vm15 = vcmask 851712  }
  0x2f   : > { %3304 = vmatprep.subr.bf16.mxu0 %v3303_v3  ;;  %v3309_v13 = vpack.c.bf16 %v547_v11, %v543_v10  ;;  %3308 = vmatprep.subr.bf16.mxu1 %v3307_v8  ;;  %v524_v26 = vld [vmem:[%s517_s5] sm:$0xff]  ;;  %v3328_v41 = vpack.c.bf16 %v869_v40, %v868_v39  ;;  %v870_v46 = vld [vmem:[%s5504_s7 + $0x10] sm:$0xff]  ;;  %v965_v50 = vld [vmem:[%s5506_s9 + $0x18] sm:$0xff]  ;;  %s5375_s23 = sshll.u32 %s5525_s28, 3  ;;  %s5388_s21 = sshll.u32 %s3946_s0, 7 }
  0x30   : > { %3306 = vmatpush1.bf16.msra.mxu0 %v3305_v9  ;;  %v962_v42 = vld [vmem:[%s5506_s9] sm:$0xff]  ;;  %v3331_v48 = vpack.c.bf16 %v871_v47, %v870_v46  ;;  %v964_v49 = vld [vmem:[%s5506_s9 + $0x10] sm:$0xff]  ;;  %v1097_v53 = vld [vmem:[%s5508_s11 + $0x8] sm:$0xff]  ;;  %s5526_s27 = scalar_lea.vmem [#allocation4], %s5375_s23  ;;  %s5394_s19 = scalar_lea.hbm %s5511_s14, %s5388_s21 }
  0x31   : > { %3310 = vmatpush1.bf16.msra.mxu1 %v3309_v13  ;;  %3312 = vmatprep.subr.bf16.mxu0 %v3311_v17  ;;  %v3334_v45 = vpack.c.bf16 %v963_v43, %v962_v42  ;;  %v3337_v51 = vpack.c.bf16 %v965_v50, %v964_v49  ;;  %v1096_v52 = vld [vmem:[%s5508_s11] sm:$0xff]  ;;  %v1081_v16 = vld [vmem:[%s4122_s17 + $0x8] sm:$0xff]  ;;  %v1090_v19 = vld [vmem:[%s4122_s17 + $0x50] sm:$0xff]  ;;  %s5404_s0 = scalar_lea.sflag [#allocation7], %s2990_s30  ;;  %s3830_s5 = smov [#allocation6]  }
  0x32   : > { %3320 = vmatprep.subr.bf16.mxu1 %v3319_v18  ;;  %v3339_v54 = vpack.c.bf16 %v1097_v53, %v1096_v52  ;;  %v841_v58 = vld [vmem:[%s5503_s6] sm:$0xf]  ;;  %v1089_v17 = vld [vmem:[%s4122_s17 + $0x48] sm:$0xff]  ;;  %v1082_v18 = vld [vmem:[%s4122_s17 + $0x10] sm:$0xff]  ;;  %s3700_s18 = sshll.u32 %s3830_s5, 4  ;;  %s3701_s18 = int_to_ptr.vmem [resolvable:$false] %s3700_s18 }
  0x33   : > { %3190 = vmatmul.mubr.msk.f32.vlgmr.msra.gmra.mrb[0].mxu0 %vm549_vm0, %v524_v26  ;;  %v846_v62 = vrot.slane %v841_v58, %v4106_v57  ;;  %v854_v63 = vrot.slane %v841_v58, %v853_v59  ;;  %v850_v0 = vrot.slane %v841_v58, %v849_v60  ;;  %v858_v1 = vrot.slane %v841_v58, %v857_v61  ;;  %v1080_v13 = vld [vmem:[%s4122_s17] sm:$0xff]  ;;  %v1083_v20 = vld [vmem:[%s4122_s17 + $0x18] sm:$0xff]  ;;  %v1085_v24 = vld [vmem:[%s4122_s17 + $0x28] sm:$0xff] }
  0x34   : > { %3191 = vmatmul.mubr.msk.f32.vlgmr.msra.gmra.mrb[0].mxu1 %vm549_vm0, %v524_v26  ;;  %3314 = vmatpush1.bf16.msra.mxu0 %v3313_v22  ;;  %v1088_v15 = vld [vmem:[%s4122_s17 + $0x40] sm:$0xff]  ;;  %v1091_v21 = vld [vmem:[%s4122_s17 + $0x58] sm:$0xff]  ;;  %v1093_v25 = vld [vmem:[%s4122_s17 + $0x68] sm:$0xff] }
  0x35   : > { %3322 = vmatpush1.bf16.msra.mxu1 %v3321_v27  ;;  %3316 = vmatprep.subr.bf16.mxu0 %v3315_v28  ;;  %v1084_v22 = vld [vmem:[%s4122_s17 + $0x20] sm:$0xff]  ;;  %v1086_v26 = vld [vmem:[%s4122_s17 + $0x30] sm:$0xff]  ;;  %v1087_v28 = vld [vmem:[%s4122_s17 + $0x38] sm:$0xff] }
  0x36   : > { %3324 = vmatprep.subr.bf16.mxu1 %v3323_v31  ;;  %763 = vmatprep.mubr.f32.mxu0 %v5519_v7  ;;  %v1092_v23 = vld [vmem:[%s4122_s17 + $0x60] sm:$0xff]  ;;  %v1094_v27 = vld [vmem:[%s4122_s17 + $0x70] sm:$0xff]  ;;  %v1095_v29 = vld [vmem:[%s4122_s17 + $0x78] sm:$0xff]  ;;  %s502_s17 = scalar_lea.vmem [#allocation6], %s5375_s23 }
  0x37   : > { %834 = vmatprep.mubr.f32.mxu1 %v5519_v7  ;;  %v3194_v47 = vld [vmem:[%s5505_s8] ss:$0 sm:$0xff]  ;;  %s3022_s20 = sshll.u32 %s502_s17, 4  ;;  %s5396_s20 = int_to_ptr.vmem [resolvable:$true] %s3022_s20 }
  0x38   : > { %3318 = vmatpush1.bf16.msra.mxu0 %v3317_v35  ;;  %v3826_v35 = vmov 1966171168   ;;  %v3196_v49 = vld [vmem:[%s5507_s10] ss:$0 sm:$0xff]  ;;  %s3696_s28 = scalar_lea.vmem %s5396_s20, 128  ;;  %p3703_p3 = scmp.lt.s32.totalorder %s5396_s20, %s3701_s18 }
  0x39   : > { %3326 = vmatpush1.bf16.msra.mxu1 %v3325_v37  ;;  %3327 = vmatprep.subr.bf16.mxu0 %v3824_v44  ;;  %v1294_v36 = vunpack.c.l.s4 %v3826_v35  ;;  %p3697_p0 = scmp.ne.s32.totalorder %s5396_s20, %s3696_s28 }
  0x3a   : > { %3333 = vmatprep.subr.bf16.mxu1 %v3824_v44 }
  0x3b   : > { %3192 = vmatmul.mubr.msk.f32.vlgmr.msra.gmra.mrb[0].mxu0 %vm695_vm1, %v523_v38  ;;  %v1295_v37 = vunpack.c.0.s8 %v1294_v36  ;;  %p3698_p1 = pnand %p3697_p0, %p3965_p8 }
  0x3c   : > { %3193 = vmatmul.mubr.msk.f32.vlgmr.msra.gmra.mrb[0].mxu1 %vm695_vm1, %v523_v38  ;;  %3329 = vmatpush3.bf16.msra.mxu0 %v3328_v41 }
  0x3d   : > { %3335 = vmatpush3.bf16.msra.mxu1 %v3334_v45  ;;  %3330 = vmatprep.subr.bf16.mxu0 %v3824_v44  ;;  %v1298_v38 = vsub.s32 %v1295_v37, %v4103_v56  ;;  %p3699_p2 = pneg %p3698_p1 }
  0x3e   : > { %3336 = vmatprep.subr.bf16.mxu1 %v3824_v44  ;;  %3261 = vmatprep.mubr.msk.f32.mxu0 %vm3825_vm2, %v5519_v7 }
  0x3f   : > { %3272 = vmatprep.mubr.msk.f32.mxu1 %vm3825_vm2, %v5519_v7  ;;  %vm2396_vm2 = vcmask 1048512  }
  0x40   : > { %3332 = vmatpush3.bf16.msra.mxu0 %v3331_v48 }
  0x41   : > { %3338 = vmatpush3.bf16.msra.mxu1 %v3337_v51  ;;  %3340 = vmatprep.subr.bf16.mxu0 %v3339_v54 }
  0x42   : > { %3343 = vmatprep.subr.bf16.mxu1 %v3339_v54 }
 0x10e   : > { %v765_v2 = vpop.f32.mrb[0].mxu0 }
 0x10f   : > { %v863_v3 = vadd.f32 %v846_v62, %v765_v2  ;;  %v836_v4 = vpop.f32.mrb[0].mxu1  ;;  %v767_v5 = vpop.f32.mrb[1].mxu0 }
 0x110   : > { %v4115_v6 = vadd.f32 %v854_v63, %v836_v4  ;;  %v864_v8 = vadd.f32 %v850_v0, %v767_v5  ;;  %v838_v9 = vpop.f32.mrb[1].mxu1 }
 0x111   : > { %3409 = vtanh.f32 %v863_v3  ;;  %v866_v10 = vadd.f32 %v858_v1, %v838_v9 }
 0x112   : > { %3411 = vtanh.f32 %v864_v8  ;;  %v1292_v39 = vcombine.high %v4115_v6, %v4115_v6  ;;  %v1299_v40 = vrot.slane %v4115_v6, %v1298_v38 }
 0x113   : > { %v1056_v11 = vsel %vm1055_vm3, %v866_v10, -inf }
 0x114   : > { %1057 = vmax.xlane.f32.xlu0 %v1056_v11  ;;  %v1306_v41 = vrot.slane %v1292_v39, %v1298_v38  ;;  %v1307_v42 = vcombine.high %v1299_v40, %v1299_v40  ;;  %v1315_v43 = vrot.slane %v1299_v40, %v1298_v38 }
 0x116   : > { %v1308_v44 = vcombine.high %v1306_v41, %v1306_v41  ;;  %v1329_v45 = vrot.slane %v1307_v42, %v1298_v38  ;;  %v1322_v46 = vrot.slane %v1306_v41, %v1298_v38  ;;  %v1337_v48 = vcombine.high %v1315_v43, %v1315_v43 }
 0x117   : > { %v4177_v62 = vrot.slane %v1315_v43, %v4106_v57 }
 0x118   : > { %v1336_v50 = vrot.slane %v1308_v44, %v1298_v38  ;;  %v1339_v52 = vcombine.high %v1329_v45, %v1329_v45  ;;  %v1338_v59 = vcombine.high %v1322_v46, %v1322_v46  ;;  %v4180_v63 = vrot.slane %v1329_v45, %v4106_v57 }
 0x119   : > { %v4183_v0 = vrot.slane %v1337_v48, %v4106_v57 }
 0x11a   : > { %v4187_v1 = vrot.slane %v1336_v50, %v4106_v57  ;;  %v4191_v3 = vrot.slane %v1339_v52, %v4106_v57 }
 0x11b   : > { %v3410_v12 = vpop.eup %3409 }
 0x11c   : > { %v3412_v14 = vpop.eup %3411  ;;  %3262 = vmatmul.mubr.msk.f32.vlgmr.msra.gmra.mrb[2].mxu0 %vm695_vm1, %v3410_v12 }
 0x11d   : > { %3273 = vmatmul.mubr.msk.f32.vlgmr.msra.gmra.mrb[2].mxu1 %vm695_vm1, %v3412_v14  ;;  %3342 = vmatpush3.bf16.msra.mxu0 %v3339_v54 }
 0x11e   : > { %3344 = vmatpush3.bf16.msra.mxu1 %v3339_v54  ;;  %3279 = vmatprep.mubr.msk.f32.mxu0 %vm549_vm0, %v1080_v13 }
 0x11f   : > { %3291 = vmatprep.mubr.msk.f32.mxu1 %vm549_vm0, %v1088_v15 }
 0x120   : > { %3280 = vmatmul.mubr.msk.f32.vlgmr.msra.gmra.mrb[4].mxu0 %vm549_vm0, %v1081_v16  ;;  %v1340_v16 = vcombine.high %v1336_v50, %v1336_v50 }
 0x121   : > { %3292 = vmatmul.mubr.msk.f32.vlgmr.msra.gmra.mrb[4].mxu1 %vm549_vm0, %v1089_v17  ;;  %3282 = vmatprep.mubr.msk.f32.mxu0 %vm549_vm0, %v1082_v18  ;;  %v4211_v17 = vrot.slane %v1322_v46, %v4106_v57 }
 0x122   : > { %3294 = vmatprep.mubr.msk.f32.mxu1 %vm549_vm0, %v1090_v19 }
 0x124   : > { %3283 = vmatmul.mubr.msk.f32.gmra.mrb[6].mxu0 %vm549_vm0, %v1083_v20 }
 0x125   : > { %3295 = vmatmul.mubr.msk.f32.gmra.mrb[6].mxu1 %vm549_vm0, %v1091_v21  ;;  %3285 = vmatprep.mubr.msk.f32.mxu0 %vm549_vm0, %v1084_v22 }
 0x126   : > { %3297 = vmatprep.mubr.msk.f32.mxu1 %vm549_vm0, %v1092_v23 }
 0x128   : > { %3286 = vmatmul.mubr.msk.f32.gmra.mrb[8].mxu0 %vm549_vm0, %v1085_v24  ;;  %v4225_v24 = vrot.slane %v1340_v16, %v4106_v57 }
 0x129   : > { %3298 = vmatmul.mubr.msk.f32.gmra.mrb[8].mxu1 %vm549_vm0, %v1093_v25  ;;  %3288 = vmatprep.mubr.msk.f32.mxu0 %vm549_vm0, %v1086_v26 }
 0x12a   : > { %3300 = vmatprep.mubr.msk.f32.mxu1 %vm549_vm0, %v1094_v27 }
 0x12c   : > { %3289 = vmatmul.mubr.msk.f32.gmra.mrb[10].mxu0 %vm549_vm0, %v1087_v28  ;;  %v4236_v28 = vld [vmem:[%s5509_s12] ss:$0 sm:$0xff] }
 0x12d   : > { %3301 = vmatmul.mubr.msk.f32.gmra.mrb[10].mxu1 %vm549_vm0, %v1095_v29  ;;  %vm2382_vm0 = vcmask 917312  }
 0x1a1   : > { %v1058_v30 = vpop.xlane.xlu0 %1057 }
 0x1a2   : > { %v1059_v31 = vsub.f32 %v866_v10, %v1058_v30  ;;  %v4201_v10 = vrot.slane %v1338_v59, %v4106_v57 }
 0x1a4   : > { %v1060_v32 = vmul.f32 1.442695, %v1059_v31 }
 0x1a6   : > { %3413 = vpow2.f32 %v1060_v32 }
 0x1b0   : > { %v4158_v33 = vpop.eup %3413 }
 0x1b1   : > { %v1062_v34 = vsel %vm1055_vm3, %v4158_v33, 0.0  ;;  %vm2951_vm3 = vcmask 1041409  }
 0x1b2   : > { %1063 = vadd.xlane.f32.xlu1 %v1062_v34 }
 0x1ef   : > { %v948_v51 = vpop.f32.mrb[2].mxu0 }
 0x1f0   : > { %v4172_v53 = vadd.f32 %v3194_v47, %v948_v51  ;;  %v3263_v54 = vpop.f32.mrb[3].mxu0  ;;  %v1042_v58 = vpop.f32.mrb[2].mxu1 }
 0x1f1   : > { %v4174_v60 = vadd.f32 %v3196_v49, %v1042_v58  ;;  %v3274_v61 = vpop.f32.mrb[3].mxu1 }
 0x1f2   : > { %952 = vmax.xlane.f32.xlu0 %v4172_v53 }
 0x1f3   : > { %v3281_v2 = vpop.f32.mrb[4].mxu0  ;;  %1046 = vmax.xlane.f32.xlu1 %v4174_v60 }
 0x1f4   : > { %v4193_v4 = vpop.f32.mrb[5].mxu0  ;;  %v4195_v5 = vpop.f32.mrb[4].mxu1  ;;  %v1382_v6 = vadd.f32 %v3281_v2, %v4177_v62  ;;  %v1398_v8 = vadd.f32 %v3281_v2, %v4180_v63  ;;  %v1414_v9 = vadd.f32 %v3281_v2, %v4183_v0  ;;  %v1462_v12 = vadd.f32 %v3281_v2, %v4187_v1 }
 0x1f5   : > { %v4203_v11 = vpop.f32.mrb[5].mxu1  ;;  %v1430_v13 = vadd.f32 %v3281_v2, %v4191_v3  ;;  %v1478_v15 = vadd.f32 %v3281_v2, %v4201_v10  ;;  %v1446_v21 = vadd.f32 %v3281_v2, %v4211_v17  ;;  %v1381_v23 = vadd.f32 %v4177_v62, %v4193_v4 }
 0x1f6   : > { %3415 = vtanh.f32 %v1382_v6  ;;  %v1494_v29 = vadd.f32 %v3281_v2, %v4225_v24  ;;  %v1397_v57 = vadd.f32 %v4180_v63, %v4193_v4  ;;  %v1461_v40 = vadd.f32 %v4187_v1, %v4193_v4 }
 0x1f7   : > { %v4207_v14 = vpop.f32.mrb[6].mxu0  ;;  %3417 = vtanh.f32 %v1398_v8  ;;  %v1413_v44 = vadd.f32 %v4183_v0, %v4193_v4  ;;  %v1477_v49 = vadd.f32 %v4201_v10, %v4193_v4  ;;  %v1429_v52 = vadd.f32 %v4191_v3, %v4193_v4 }
 0x1f8   : > { %v4213_v18 = vpop.f32.mrb[7].mxu0  ;;  %v4215_v19 = vpop.f32.mrb[6].mxu1  ;;  %3419 = vtanh.f32 %v1414_v9  ;;  %v1406_v2 = vadd.f32 %v4195_v5, %v4180_v63  ;;  %v1445_v9 = vadd.f32 %v4211_v17, %v4193_v4 }
 0x1f9   : > { %v4217_v20 = vpop.f32.mrb[7].mxu1  ;;  %3421 = vtanh.f32 %v1462_v12 }
 0x1fa   : > { %3423 = vtanh.f32 %v1430_v13 }
 0x1fb   : > { %v4220_v22 = vpop.f32.mrb[8].mxu0  ;;  %3425 = vtanh.f32 %v1478_v15 }
 0x1fc   : > { %v4227_v25 = vpop.f32.mrb[9].mxu0  ;;  %v4229_v26 = vpop.f32.mrb[8].mxu1  ;;  %3427 = vtanh.f32 %v1446_v21  ;;  %v1438_v21 = vadd.f32 %v4195_v5, %v4191_v3 }
 0x1fd   : > { %v4231_v27 = vpop.f32.mrb[9].mxu1  ;;  %3429 = vtanh.f32 %v1381_v23 }
 0x1fe   : > { %3431 = vtanh.f32 %v1494_v29 }
 0x1ff   : > { %v4239_v30 = vpop.f32.mrb[10].mxu0  ;;  %3433 = vtanh.f32 %v1397_v57  ;;  %v1493_v57 = vadd.f32 %v4225_v24, %v4193_v4  ;;  %v1390_v4 = vadd.f32 %v4195_v5, %v4177_v62 }
 0x200   : > { %v3416_v31 = vpop.eup %3415  ;;  %v4243_v32 = vpop.f32.mrb[11].mxu0  ;;  %3435 = vtanh.f32 %v1461_v40 }
 0x201   : > { %v4245_v34 = vpop.f32.mrb[10].mxu1  ;;  %v3418_v35 = vpop.eup %3417  ;;  %v1645_v37 = vmul.f32 %v3416_v31, %v4236_v28  ;;  %3437 = vtanh.f32 %v1413_v44 }
 0x202   : > { %v4247_v36 = vpop.f32.mrb[11].mxu1  ;;  %v3420_v38 = vpop.eup %3419  ;;  %v1661_v39 = vmul.f32 %v3418_v35, %v4236_v28  ;;  %3439 = vtanh.f32 %v1477_v49  ;;  %v1422_v49 = vadd.f32 %v4195_v5, %v4183_v0 }
 0x203   : > { %v3422_v41 = vpop.eup %3421  ;;  %v1775_v42 = vsel %vm695_vm1, %v1645_v37, 0.0  ;;  %v1677_v43 = vmul.f32 %v3420_v38, %v4236_v28  ;;  %3441 = vtanh.f32 %v1429_v52 }
 0x204   : > { %v3424_v45 = vpop.eup %3423  ;;  %1776 = vadd.xlane.f32.xlu0 %v1775_v42  ;;  %v1823_v46 = vsel %vm695_vm1, %v1661_v39, 0.0  ;;  %v1725_v47 = vmul.f32 %v3422_v41, %v4236_v28  ;;  %3443 = vtanh.f32 %v1406_v2  ;;  %v1470_v39 = vadd.f32 %v4195_v5, %v4187_v1 }
 0x205   : > { %v3426_v48 = vpop.eup %3425  ;;  %1824 = vadd.xlane.f32.xlu1 %v1823_v46  ;;  %v1871_v50 = vsel %vm695_vm1, %v1677_v43, 0.0  ;;  %v1693_v51 = vmul.f32 %v3424_v45, %v4236_v28  ;;  %3445 = vtanh.f32 %v1445_v9  ;;  %v1502_v46 = vadd.f32 %v4195_v5, %v4225_v24 }
 0x206   : > { %v3428_v54 = vpop.eup %3427  ;;  %v2015_v58 = vsel %vm695_vm1, %v1725_v47, 0.0  ;;  %v1741_v59 = vmul.f32 %v3426_v48, %v4236_v28  ;;  %3447 = vtanh.f32 %v1438_v21  ;;  %v1454_v2 = vadd.f32 %v4195_v5, %v4211_v17 }
 0x207   : > { %v3430_v61 = vpop.eup %3429  ;;  %v1919_v6 = vsel %vm695_vm1, %v1693_v51, 0.0  ;;  %v1709_v8 = vmul.f32 %v3428_v54, %v4236_v28  ;;  %3449 = vtanh.f32 %v1493_v57  ;;  %v1486_v21 = vadd.f32 %v4195_v5, %v4201_v10 }
 0x208   : > { %1872 = vadd.xlane.f32.xlu0 %v1871_v50  ;;  %v3432_v12 = vpop.eup %3431  ;;  %v2063_v13 = vsel %vm695_vm1, %v1741_v59, 0.0  ;;  %v1644_v15 = vmul.f32 %v3430_v61, %v4236_v28  ;;  %3451 = vtanh.f32 %v1470_v39  ;;  %v1389_v5 = vadd.f32 %v4177_v62, %v4203_v11 }
 0x209   : > { %2016 = vadd.xlane.f32.xlu1 %v2015_v58  ;;  %v3434_v16 = vpop.eup %3433  ;;  %v1967_v23 = vsel %vm695_vm1, %v1709_v8, 0.0  ;;  %v1757_v29 = vmul.f32 %v3432_v12, %v4236_v28  ;;  %3453 = vtanh.f32 %v1390_v4  ;;  %v1405_v58 = vadd.f32 %v4180_v63, %v4203_v11 }
 0x20a   : > { %v3436_v31 = vpop.eup %3435  ;;  %v1772_v35 = vsel %vm695_vm1, %v1644_v15, 0.0  ;;  %v1660_v37 = vmul.f32 %v3434_v16, %v4236_v28  ;;  %3455 = vtanh.f32 %v1502_v46 }
 0x20b   : > { %v3438_v38 = vpop.eup %3437  ;;  %v2111_v40 = vsel %vm695_vm1, %v1757_v29, 0.0  ;;  %v1724_v41 = vmul.f32 %v3436_v31, %v4236_v28  ;;  %3457 = vtanh.f32 %v1422_v49 }
 0x20c   : > { %1920 = vadd.xlane.f32.xlu0 %v1919_v6  ;;  %v3440_v42 = vpop.eup %3439  ;;  %v1820_v43 = vsel %vm695_vm1, %v1660_v37, 0.0  ;;  %v1676_v44 = vmul.f32 %v3438_v38, %v4236_v28  ;;  %3459 = vtanh.f32 %v1405_v58 }
 0x20d   : > { %2064 = vadd.xlane.f32.xlu1 %v2063_v13  ;;  %v3442_v45 = vpop.eup %3441  ;;  %v2012_v47 = vsel %vm695_vm1, %v1724_v41, 0.0  ;;  %v1740_v48 = vmul.f32 %v3440_v42, %v4236_v28  ;;  %v1437_v13 = vadd.f32 %v4191_v3, %v4203_v11  ;;  %3461 = vtanh.f32 %v1454_v2 }
 0x20e   : > { %v3444_v50 = vpop.eup %3443  ;;  %v1868_v51 = vsel %vm695_vm1, %v1676_v44, 0.0  ;;  %v1692_v52 = vmul.f32 %v3442_v45, %v4236_v28  ;;  %v1501_v42 = vadd.f32 %v4225_v24, %v4203_v11  ;;  %v1421_v45 = vadd.f32 %v4183_v0, %v4203_v11 }
 0x20f   : > { %v3446_v54 = vpop.eup %3445  ;;  %v2060_v59 = vsel %vm695_vm1, %v1740_v48, 0.0  ;;  %v1669_v61 = vmul.f32 %v3444_v50, %v4236_v28  ;;  %3463 = vtanh.f32 %v1437_v13  ;;  %v1432_v50 = vadd.f32 %v4207_v14, %v4191_v3 }
 0x210   : > { %1968 = vadd.xlane.f32.xlu0 %v1967_v23  ;;  %v3448_v6 = vpop.eup %3447  ;;  %v1916_v8 = vsel %vm695_vm1, %v1692_v52, 0.0  ;;  %v1708_v9 = vmul.f32 %v3446_v54, %v4236_v28  ;;  %3465 = vtanh.f32 %v1486_v21  ;;  %v1453_v54 = vadd.f32 %v4211_v17, %v4203_v11 }
 0x211   : > { %1773 = vadd.xlane.f32.xlu1 %v1772_v35  ;;  %v3450_v12 = vpop.eup %3449  ;;  %v1847_v15 = vsel %vm695_vm1, %v1669_v61, 0.0  ;;  %v1701_v16 = vmul.f32 %v3448_v6, %v4236_v28  ;;  %v1469_v35 = vadd.f32 %v4187_v1, %v4203_v11  ;;  %v1448_v6 = vadd.f32 %v4207_v14, %v4211_v17 }
 0x212   : > { %v3452_v23 = vpop.eup %3451  ;;  %v1964_v29 = vsel %vm695_vm1, %v1708_v9, 0.0  ;;  %v1756_v57 = vmul.f32 %v3450_v12, %v4236_v28  ;;  %v1485_v12 = vadd.f32 %v4201_v10, %v4203_v11  ;;  %v1384_v11 = vadd.f32 %v4207_v14, %v4177_v62 }
 0x213   : > { %v3454_v31 = vpop.eup %3453  ;;  %v1943_v37 = vsel %vm695_vm1, %v1701_v16, 0.0  ;;  %v1733_v38 = vmul.f32 %v3452_v23, %v4236_v28  ;;  %3467 = vtanh.f32 %v1469_v35  ;;  %v1496_v23 = vadd.f32 %v4207_v14, %v4225_v24 }
 0x214   : > { %2112 = vadd.xlane.f32.xlu0 %v2111_v40  ;;  %v3456_v39 = vpop.eup %3455  ;;  %v2108_v40 = vsel %vm695_vm1, %v1756_v57, 0.0  ;;  %v1653_v41 = vmul.f32 %v3454_v31, %v4236_v28  ;;  %3469 = vtanh.f32 %v1389_v5  ;;  %v1415_v5 = vadd.f32 %v4183_v0, %v4213_v18 }
 0x215   : > { %1821 = vadd.xlane.f32.xlu1 %v1820_v43  ;;  %v3458_v4 = vpop.eup %3457  ;;  %v2039_v43 = vsel %vm695_vm1, %v1733_v38, 0.0  ;;  %v1765_v44 = vmul.f32 %v3456_v39, %v4236_v28  ;;  %3471 = vtanh.f32 %v1501_v42 }
 0x216   : > { %v3460_v46 = vpop.eup %3459  ;;  %v1685_v48 = vmul.f32 %v3458_v4, %v4236_v28  ;;  %3473 = vtanh.f32 %v1421_v45  ;;  %v1431_v45 = vadd.f32 %v4191_v3, %v4213_v18 }
 0x217   : > { %v3462_v49 = vpop.eup %3461  ;;  %v1668_v52 = vmul.f32 %v3460_v46, %v4236_v28  ;;  %3475 = vtanh.f32 %v1432_v50 }
 0x218   : > { %2013 = vadd.xlane.f32.xlu0 %v2012_v47  ;;  %v1799_v47 = vsel %vm695_vm1, %v1653_v41, 0.0  ;;  %v1717_v61 = vmul.f32 %v3462_v49, %v4236_v28  ;;  %3477 = vtanh.f32 %v1453_v54  ;;  %v1400_v41 = vadd.f32 %v4207_v14, %v4180_v63 }
 0x219   : > { %1869 = vadd.xlane.f32.xlu1 %v1868_v51  ;;  %v2135_v51 = vsel %vm695_vm1, %v1765_v44, 0.0  ;;  %v3464_v58 = vpop.eup %3463  ;;  %3479 = vtanh.f32 %v1448_v6  ;;  %v1479_v54 = vadd.f32 %v4201_v10, %v4213_v18 }
 0x21a   : > { %v3466_v2 = vpop.eup %3465  ;;  %v1700_v9 = vmul.f32 %v3464_v58, %v4236_v28  ;;  %3481 = vtanh.f32 %v1485_v12  ;;  %v1495_v12 = vadd.f32 %v4225_v24, %v4213_v18 }
 0x21b   : > { %v1749_v16 = vmul.f32 %v3466_v2, %v4236_v28  ;;  %3483 = vtanh.f32 %v1496_v23 }
 0x21c   : > { %2061 = vadd.xlane.f32.xlu0 %v2060_v59  ;;  %v1895_v59 = vsel %vm695_vm1, %v1685_v48, 0.0  ;;  %3485 = vtanh.f32 %v1384_v11  ;;  %v1416_v48 = vadd.f32 %v4207_v14, %v4183_v0  ;;  %v1408_v11 = vadd.f32 %v4215_v19, %v4180_v63 }
 0x21d   : > { %1917 = vadd.xlane.f32.xlu1 %v1916_v8  ;;  %v1844_v8 = vsel %vm695_vm1, %v1668_v52, 0.0  ;;  %v3468_v13 = vpop.eup %3467  ;;  %v2087_v35 = vsel %vm695_vm1, %v1749_v16, 0.0  ;;  %3487 = vtanh.f32 %v1415_v5  ;;  %v1480_v16 = vadd.f32 %v4207_v14, %v4201_v10 }
 0x21e   : > { %v3470_v21 = vpop.eup %3469  ;;  %v1732_v57 = vmul.f32 %v3468_v13, %v4236_v28  ;;  %3489 = vtanh.f32 %v1400_v41 }
 0x21f   : > { %v3472_v31 = vpop.eup %3471  ;;  %3491 = vtanh.f32 %v1431_v45 }
 0x220   : > { %1848 = vadd.xlane.f32.xlu0 %v1847_v15  ;;  %v1991_v15 = vsel %vm695_vm1, %v1717_v61, 0.0  ;;  %v3474_v38 = vpop.eup %3473  ;;  %v2036_v39 = vsel %vm695_vm1, %v1732_v57, 0.0  ;;  %3493 = vtanh.f32 %v1416_v48  ;;  %v1464_v61 = vadd.f32 %v4207_v14, %v4187_v1 }
 0x221   : > { %1965 = vadd.xlane.f32.xlu1 %v1964_v29  ;;  %v1940_v29 = vsel %vm695_vm1, %v1700_v9, 0.0  ;;  %v3476_v4 = vpop.eup %3475  ;;  %3495 = vtanh.f32 %v1479_v54  ;;  %v1383_v14 = vadd.f32 %v4177_v62, %v4213_v18 }
 0x222   : > { %v3478_v44 = vpop.eup %3477  ;;  %3497 = vtanh.f32 %v1464_v61 }
 0x223   : > { %v3480_v49 = vpop.eup %3479  ;;  %3499 = vtanh.f32 %v1495_v12 }
 0x224   : > { %1944 = vadd.xlane.f32.xlu0 %v1943_v37  ;;  %v1652_v37 = vmul.f32 %v3470_v21, %v4236_v28  ;;  %v3482_v52 = vpop.eup %3481  ;;  %3501 = vtanh.f32 %v1480_v16 }
 0x225   : > { %2109 = vadd.xlane.f32.xlu1 %v2108_v40  ;;  %v1764_v40 = vmul.f32 %v3472_v31, %v4236_v28  ;;  %v3484_v2 = vpop.eup %3483  ;;  %3503 = vtanh.f32 %v1408_v11 }
 0x226   : > { %v1796_v42 = vsel %vm695_vm1, %v1652_v37, 0.0  ;;  %v3486_v9 = vpop.eup %3485  ;;  %3505 = vtanh.f32 %v1383_v14 }
 0x227   : > { %v2132_v46 = vsel %vm695_vm1, %v1764_v40, 0.0  ;;  %v3488_v21 = vpop.eup %3487  ;;  %v1440_v40 = vadd.f32 %v4215_v19, %v4191_v3 }
 0x228   : > { %2040 = vadd.xlane.f32.xlu0 %v2039_v43  ;;  %v1684_v43 = vmul.f32 %v3474_v38, %v4236_v28  ;;  %v3490_v57 = vpop.eup %3489 }
 0x229   : > { %1800 = vadd.xlane.f32.xlu1 %v1799_v47  ;;  %v1695_v47 = vmul.f32 %v3476_v4, %v4236_v28  ;;  %v3492_v37 = vpop.eup %3491  ;;  %v1663_v5 = vmul.f32 %v3490_v57, %v4236_v28  ;;  %3507 = vtanh.f32 %v1440_v40 }
 0x22a   : > { %v1892_v50 = vsel %vm695_vm1, %v1684_v43, 0.0  ;;  %v1694_v4 = vmul.f32 %v3492_v37, %v4236_v28  ;;  %v1424_v37 = vadd.f32 %v4215_v19, %v4183_v0 }
 0x22b   : > { %v1925_v58 = vsel %vm695_vm1, %v1695_v47, 0.0  ;;  %v1472_v47 = vadd.f32 %v4215_v19, %v4187_v1 }
 0x22c   : > { %2136 = vadd.xlane.f32.xlu0 %v2135_v51  ;;  %v1716_v51 = vmul.f32 %v3478_v44, %v4236_v28  ;;  %v1829_v44 = vsel %vm695_vm1, %v1663_v5, 0.0  ;;  %v1922_v48 = vsel %vm695_vm1, %v1694_v4, 0.0 }
 0x22d   : > { %1896 = vadd.xlane.f32.xlu1 %v1895_v59  ;;  %v1711_v59 = vmul.f32 %v3480_v49, %v4236_v28 }
 0x22e   : > { %v1988_v6 = vsel %vm695_vm1, %v1716_v51, 0.0 }
 0x22f   : > { %v1973_v13 = vsel %vm695_vm1, %v1711_v59, 0.0  ;;  %v1407_v59 = vadd.f32 %v4180_v63, %v4217_v20 }
 0x230   : > { %1845 = vadd.xlane.f32.xlu0 %v1844_v8  ;;  %v1748_v8 = vmul.f32 %v3482_v52, %v4236_v28 }
 0x231   : > { %1992 = vadd.xlane.f32.xlu1 %v1991_v15  ;;  %v1759_v15 = vmul.f32 %v3484_v2, %v4236_v28 }
 0x232   : > { %v2084_v23 = vsel %vm695_vm1, %v1748_v8, 0.0 }
 0x233   : > { %v2117_v31 = vsel %vm695_vm1, %v1759_v15, 0.0  ;;  %v1439_v15 = vadd.f32 %v4191_v3, %v4217_v20 }
 0x234   : > { %1941 = vadd.xlane.f32.xlu0 %v1940_v29  ;;  %v1647_v29 = vmul.f32 %v3486_v9, %v4236_v28 }
 0x235   : > { %2088 = vadd.xlane.f32.xlu1 %v2087_v35  ;;  %v1678_v35 = vmul.f32 %v3488_v21, %v4236_v28 }
 0x236   : > { %v1781_v38 = vsel %vm695_vm1, %v1647_v29, 0.0 }
 0x237   : > { %v1874_v41 = vsel %vm695_vm1, %v1678_v35, 0.0 }
 0x238   : > { %2037 = vadd.xlane.f32.xlu0 %v2036_v39  ;;  %v3494_v39 = vpop.eup %3493 }
 0x239   : > { %1797 = vadd.xlane.f32.xlu1 %v1796_v42  ;;  %v1399_v42 = vadd.f32 %v4180_v63, %v4213_v18  ;;  %v3496_v43 = vpop.eup %3495  ;;  %v1679_v45 = vmul.f32 %v3494_v39, %v4236_v28 }
 0x23a   : > { %v1742_v49 = vmul.f32 %v3496_v43, %v4236_v28  ;;  %v1456_v43 = vadd.f32 %v4215_v19, %v4211_v17 }
 0x23b   : > { %3509 = vtanh.f32 %v1399_v42  ;;  %v1877_v52 = vsel %vm695_vm1, %v1679_v45, 0.0 }
 0x23c   : > { %2133 = vadd.xlane.f32.xlu0 %v2132_v46  ;;  %v3498_v46 = vpop.eup %3497  ;;  %3511 = vtanh.f32 %v1472_v47  ;;  %v2066_v61 = vsel %vm695_vm1, %v1742_v49, 0.0 }
 0x23d   : > { %1893 = vadd.xlane.f32.xlu1 %v1892_v50  ;;  %v1447_v50 = vadd.f32 %v4211_v17, %v4213_v18  ;;  %v3500_v51 = vpop.eup %3499  ;;  %v1727_v54 = vmul.f32 %v3498_v46, %v4236_v28 }
 0x23e   : > { %v1758_v2 = vmul.f32 %v3500_v51, %v4236_v28  ;;  %v1488_v51 = vadd.f32 %v4215_v19, %v4201_v10 }
 0x23f   : > { %3513 = vtanh.f32 %v1447_v50  ;;  %v2021_v9 = vsel %vm695_vm1, %v1727_v54, 0.0 }
 0x240   : > { %1926 = vadd.xlane.f32.xlu0 %v1925_v58  ;;  %v3502_v58 = vpop.eup %3501  ;;  %3515 = vtanh.f32 %v1407_v59  ;;  %v2114_v16 = vsel %vm695_vm1, %v1758_v2, 0.0 }
 0x241   : > { %1989 = vadd.xlane.f32.xlu1 %v1988_v6  ;;  %v1463_v6 = vadd.f32 %v4187_v1, %v4213_v18  ;;  %v3504_v8 = vpop.eup %3503  ;;  %v1743_v12 = vmul.f32 %v3502_v58, %v4236_v28  ;;  %v1392_v18 = vadd.f32 %v4215_v19, %v4177_v62 }
 0x242   : > { %v1671_v21 = vmul.f32 %v3504_v8, %v4236_v28  ;;  %v1504_v8 = vadd.f32 %v4215_v19, %v4225_v24  ;;  %v1391_v19 = vadd.f32 %v4177_v62, %v4217_v20 }
 0x243   : > { %3517 = vtanh.f32 %v1463_v6  ;;  %v2069_v29 = vsel %vm695_vm1, %v1743_v12, 0.0 }
 0x244   : > { %1974 = vadd.xlane.f32.xlu0 %v1973_v13  ;;  %v3506_v13 = vpop.eup %3505  ;;  %3519 = vtanh.f32 %v1439_v15  ;;  %v1853_v35 = vsel %vm695_vm1, %v1671_v21, 0.0 }
 0x245   : > { %2085 = vadd.xlane.f32.xlu1 %v2084_v23  ;;  %v3508_v23 = vpop.eup %3507  ;;  %v1646_v57 = vmul.f32 %v3506_v13, %v4236_v28  ;;  %3521 = vtanh.f32 %v1392_v18 }
 0x246   : > { %v3510_v11 = vpop.eup %3509  ;;  %v1703_v14 = vmul.f32 %v3508_v23, %v4236_v28 }
 0x247   : > { %v1778_v5 = vsel %vm695_vm1, %v1646_v57, 0.0  ;;  %v1662_v39 = vmul.f32 %v3510_v11, %v4236_v28 }
 0x248   : > { %2118 = vadd.xlane.f32.xlu0 %v2117_v31  ;;  %v1471_v31 = vadd.f32 %v4187_v1, %v4217_v20  ;;  %v1949_v4 = vsel %vm695_vm1, %v1703_v14, 0.0 }
 0x249   : > { %1782 = vadd.xlane.f32.xlu1 %v1781_v38  ;;  %v3512_v38 = vpop.eup %3511  ;;  %v1826_v45 = vsel %vm695_vm1, %v1662_v39, 0.0 }
 0x24a   : > { %v3514_v40 = vpop.eup %3513  ;;  %3523 = vtanh.f32 %v1471_v31  ;;  %v1735_v42 = vmul.f32 %v3512_v38, %v4236_v28  ;;  %v1498_v31 = vadd.f32 %v4220_v22, %v4225_v24 }
 0x24b   : > { %3525 = vtanh.f32 %v1424_v37  ;;  %v1710_v46 = vmul.f32 %v3514_v40, %v4236_v28  ;;  %v1423_v37 = vadd.f32 %v4183_v0, %v4217_v20 }
 0x24c   : > { %1875 = vadd.xlane.f32.xlu0 %v1874_v41  ;;  %v1503_v41 = vadd.f32 %v4225_v24, %v4217_v20  ;;  %v2045_v49 = vsel %vm695_vm1, %v1735_v42, 0.0 }
 0x24d   : > { %1830 = vadd.xlane.f32.xlu1 %v1829_v44  ;;  %v3516_v44 = vpop.eup %3515  ;;  %v1970_v54 = vsel %vm695_vm1, %v1710_v46, 0.0 }
 0x24e   : > { %v3518_v47 = vpop.eup %3517  ;;  %3527 = vtanh.f32 %v1503_v41  ;;  %v1670_v50 = vmul.f32 %v3516_v44, %v4236_v28  ;;  %v1401_v41 = vadd.f32 %v4180_v63, %v4227_v25 }
 0x24f   : > { %3529 = vtanh.f32 %v1456_v43  ;;  %v1726_v58 = vmul.f32 %v3518_v47, %v4236_v28  ;;  %v1455_v43 = vadd.f32 %v4211_v17, %v4217_v20 }
 0x250   : > { %1923 = vadd.xlane.f32.xlu0 %v1922_v48  ;;  %v1402_v48 = vadd.f32 %v4220_v22, %v4180_v63  ;;  %v1850_v2 = vsel %vm695_vm1, %v1670_v50, 0.0 }
 0x251   : > { %1878 = vadd.xlane.f32.xlu1 %v1877_v52  ;;  %v3520_v52 = vpop.eup %3519  ;;  %v2018_v12 = vsel %vm695_vm1, %v1726_v58, 0.0 }
 0x252   : > { %v3522_v59 = vpop.eup %3521  ;;  %3531 = vtanh.f32 %v1402_v48  ;;  %v1702_v6 = vmul.f32 %v3520_v52, %v4236_v28  ;;  %v1449_v48 = vadd.f32 %v4211_v17, %v4227_v25 }
 0x253   : > { %3533 = vtanh.f32 %v1488_v51  ;;  %v1655_v13 = vmul.f32 %v3522_v59, %v4236_v28  ;;  %v1487_v51 = vadd.f32 %v4201_v10, %v4217_v20  ;;  %v1386_v20 = vadd.f32 %v4220_v22, %v4177_v62 }
 0x254   : > { %2067 = vadd.xlane.f32.xlu0 %v2066_v61  ;;  %v1418_v61 = vadd.f32 %v4220_v22, %v4183_v0  ;;  %v1946_v21 = vsel %vm695_vm1, %v1702_v6, 0.0 }
 0x255   : > { %2022 = vadd.xlane.f32.xlu1 %v2021_v9  ;;  %v3524_v9 = vpop.eup %3523 }
 0x256   : > { %v3526_v15 = vpop.eup %3525  ;;  %3535 = vtanh.f32 %v1418_v61  ;;  %v1734_v18 = vmul.f32 %v3524_v9, %v4236_v28  ;;  %v1465_v61 = vadd.f32 %v4187_v1, %v4227_v25 }
 0x257   : > { %3537 = vtanh.f32 %v1504_v8  ;;  %v1687_v57 = vmul.f32 %v3526_v15, %v4236_v28  ;;  %v1497_v15 = vadd.f32 %v4225_v24, %v4227_v25 }
 0x258   : > { %2115 = vadd.xlane.f32.xlu0 %v2114_v16  ;;  %v1466_v16 = vadd.f32 %v4220_v22, %v4187_v1  ;;  %v3528_v23 = vpop.eup %3527 }
 0x259   : > { %2070 = vadd.xlane.f32.xlu1 %v2069_v29  ;;  %v1805_v29 = vsel %vm695_vm1, %v1655_v13, 0.0  ;;  %v3530_v11 = vpop.eup %3529  ;;  %v1766_v14 = vmul.f32 %v3528_v23, %v4236_v28 }
 0x25a   : > { %3539 = vtanh.f32 %v1466_v16  ;;  %v1719_v39 = vmul.f32 %v3530_v11, %v4236_v28  ;;  %v1410_v11 = vadd.f32 %v4229_v26, %v4180_v63 }
 0x25b   : > { %3541 = vtanh.f32 %v1391_v19 }
 0x25c   : > { %1854 = vadd.xlane.f32.xlu0 %v1853_v35  ;;  %v2042_v35 = vsel %vm695_vm1, %v1734_v18, 0.0  ;;  %v3532_v38 = vpop.eup %3531  ;;  %3543 = vtanh.f32 %v1498_v31  ;;  %v1434_v18 = vadd.f32 %v4220_v22, %v4191_v3 }
 0x25d   : > { %1779 = vadd.xlane.f32.xlu1 %v1778_v5  ;;  %v1901_v5 = vsel %vm695_vm1, %v1687_v57, 0.0  ;;  %v3534_v40 = vpop.eup %3533  ;;  %v1665_v42 = vmul.f32 %v3532_v38, %v4236_v28  ;;  %3545 = vtanh.f32 %v1423_v37 }
 0x25e   : > { %v1751_v46 = vmul.f32 %v3534_v40, %v4236_v28  ;;  %3547 = vtanh.f32 %v1401_v41  ;;  %v1442_v40 = vadd.f32 %v4229_v26, %v4191_v3 }
 0x25f   : > { %3549 = vtanh.f32 %v1455_v43 }
 0x260   : > { %1950 = vadd.xlane.f32.xlu0 %v1949_v4  ;;  %v2138_v4 = vsel %vm695_vm1, %v1766_v14, 0.0  ;;  %v3536_v44 = vpop.eup %3535  ;;  %3551 = vtanh.f32 %v1449_v48  ;;  %v1450_v14 = vadd.f32 %v4220_v22, %v4211_v17  ;;  %v1490_v48 = vadd.f32 %v4229_v26, %v4201_v10 }
 0x261   : > { %1827 = vadd.xlane.f32.xlu1 %v1826_v45  ;;  %v1997_v45 = vsel %vm695_vm1, %v1719_v39, 0.0  ;;  %v3538_v47 = vpop.eup %3537  ;;  %v1681_v50 = vmul.f32 %v3536_v44, %v4236_v28  ;;  %3553 = vtanh.f32 %v1487_v51  ;;  %v1385_v51 = vadd.f32 %v4177_v62, %v4227_v25 }
 0x262   : > { %v1767_v58 = vmul.f32 %v3538_v47, %v4236_v28  ;;  %3555 = vtanh.f32 %v1465_v61  ;;  %v4523_v47 = vpop.xlane.xlu1 %1063 }
 0x263   : > { %3557 = vtanh.f32 %v1386_v20 }
 0x264   : > { %2046 = vadd.xlane.f32.xlu0 %v2045_v49  ;;  %v1835_v49 = vsel %vm695_vm1, %v1665_v42, 0.0  ;;  %v3540_v52 = vpop.eup %3539  ;;  %v2141_v9 = vsel %vm695_vm1, %v1767_v58, 0.0  ;;  %3559 = vtanh.f32 %v1497_v15  ;;  %v1482_v42 = vadd.f32 %v4220_v22, %v4201_v10 }
 0x265   : > { %1971 = vadd.xlane.f32.xlu1 %v1970_v54  ;;  %v2093_v54 = vsel %vm695_vm1, %v1751_v46, 0.0  ;;  %v3542_v59 = vpop.eup %3541  ;;  %v1729_v6 = vmul.f32 %v3540_v52, %v4236_v28  ;;  %3561 = vtanh.f32 %v1434_v18  ;;  %v4548_v18 = vand.u32 127, %v843_v55 }
 0x266   : > { %v3544_v8 = vpop.eup %3543  ;;  %3563 = vtanh.f32 %v1410_v11  ;;  %v1433_v11 = vadd.f32 %v4191_v3, %v4227_v25 }
 0x267   : > { %v3546_v13 = vpop.eup %3545  ;;  %v2027_v16 = vsel %vm695_vm1, %v1729_v6, 0.0  ;;  %3565 = vtanh.f32 %v1450_v14  ;;  %v1506_v6 = vadd.f32 %v4229_v26, %v4225_v24  ;;  %5536 = vst [vmem:[#allocation17_spill] sm:$0xff] %v4548_v18 }
 0x268   : > { %1851 = vadd.xlane.f32.xlu0 %v1850_v2  ;;  %v1883_v2 = vsel %vm695_vm1, %v1681_v50, 0.0  ;;  %v3548_v19 = vpop.eup %3547  ;;  %3567 = vtanh.f32 %v1442_v40 }
 0x269   : > { %2019 = vadd.xlane.f32.xlu1 %v2018_v12  ;;  %v1654_v12 = vmul.f32 %v3542_v59, %v4236_v28  ;;  %v3550_v57 = vpop.eup %3549  ;;  %3569 = vtanh.f32 %v1482_v42 }
 0x26a   : > { %v3552_v37 = vpop.eup %3551  ;;  %3571 = vtanh.f32 %v1490_v48  ;;  %v1394_v48 = vadd.f32 %v4229_v26, %v4177_v62 }
 0x26b   : > { %v1802_v23 = vsel %vm695_vm1, %v1654_v12, 0.0  ;;  %v3554_v39 = vpop.eup %3553  ;;  %3573 = vtanh.f32 %v1385_v51  ;;  %v4587_v51 = vsub.s32 %v4548_v18, %v4103_v56 }
 0x26c   : > { %1947 = vadd.xlane.f32.xlu0 %v1946_v21  ;;  %v1761_v21 = vmul.f32 %v3544_v8, %v4236_v28  ;;  %v3556_v43 = vpop.eup %3555  ;;  %3575 = vtanh.f32 %v1506_v6 }
 0x26d   : > { %1806 = vadd.xlane.f32.xlu1 %v1805_v29  ;;  %v1686_v29 = vmul.f32 %v3546_v13, %v4236_v28  ;;  %v3558_v46 = vpop.eup %3557  ;;  %v1728_v22 = vmul.f32 %v3556_v43, %v4236_v28 }
 0x26e   : > { %v2123_v31 = vsel %vm695_vm1, %v1761_v21, 0.0  ;;  %v3560_v52 = vpop.eup %3559  ;;  %v1649_v58 = vmul.f32 %v3558_v46, %v4236_v28 }
 0x26f   : > { %v1898_v38 = vsel %vm695_vm1, %v1686_v29, 0.0  ;;  %v3562_v59 = vpop.eup %3561  ;;  %v2024_v20 = vsel %vm695_vm1, %v1728_v22, 0.0  ;;  %v1760_v8 = vmul.f32 %v3560_v52, %v4236_v28 }
 0x270   : > { %2043 = vadd.xlane.f32.xlu0 %v2042_v35  ;;  %v1664_v35 = vmul.f32 %v3548_v19, %v4236_v28  ;;  %v3564_v12 = vpop.eup %3563  ;;  %v1787_v13 = vsel %vm695_vm1, %v1649_v58, 0.0  ;;  %v1697_v15 = vmul.f32 %v3562_v59, %v4236_v28 }
 0x271   : > { %1902 = vadd.xlane.f32.xlu1 %v1901_v5  ;;  %v1718_v5 = vmul.f32 %v3550_v57, %v4236_v28  ;;  %v2120_v29 = vsel %vm695_vm1, %v1760_v8, 0.0  ;;  %v1673_v57 = vmul.f32 %v3564_v12, %v4236_v28  ;;  %v1426_v8 = vadd.f32 %v4229_v26, %v4183_v0 }
 0x272   : > { %v1832_v41 = vsel %vm695_vm1, %v1664_v35, 0.0  ;;  %v1931_v35 = vsel %vm695_vm1, %v1697_v15, 0.0  ;;  %v1489_v12 = vadd.f32 %v4201_v10, %v4231_v27 }
 0x273   : > { %v1994_v44 = vsel %vm695_vm1, %v1718_v5, 0.0  ;;  %v1859_v40 = vsel %vm695_vm1, %v1673_v57, 0.0 }
 0x274   : > { %2139 = vadd.xlane.f32.xlu0 %v2138_v4  ;;  %v1712_v4 = vmul.f32 %v3552_v37, %v4236_v28 }
 0x275   : > { %1998 = vadd.xlane.f32.xlu1 %v1997_v45  ;;  %v1750_v45 = vmul.f32 %v3554_v39, %v4236_v28  ;;  %v1441_v39 = vadd.f32 %v4191_v3, %v4231_v27 }
 0x276   : > { %v1976_v50 = vsel %vm695_vm1, %v1712_v4, 0.0  ;;  %v1481_v4 = vadd.f32 %v4201_v10, %v4227_v25 }
 0x278   : > { %1836 = vadd.xlane.f32.xlu0 %v1835_v49  ;;  %v3827_v49 = vmov 0  }
 0x279   : > { %2094 = vadd.xlane.f32.xlu1 %v2093_v54  ;;  %3406 = vset.pattern.permute.xlu0 %v3827_v49  ;;  %v2090_v54 = vsel %vm695_vm1, %v1750_v45, 0.0 }
 0x27c   : > { %1884 = vadd.xlane.f32.xlu0 %v1883_v2 }
 0x27d   : > { %2142 = vadd.xlane.f32.xlu1 %v2141_v9  ;;  %v1417_v9 = vadd.f32 %v4183_v0, %v4227_v25  ;;  %v1473_v25 = vadd.f32 %v4187_v1, %v4231_v27 }
 0x27f   : > { %v4533_v61 = vpop.xlane.xlu0 %952  ;;  %3577 = vtanh.f32 %v1417_v9 }
 0x280   : > { %2028 = vadd.xlane.f32.xlu0 %v2027_v16  ;;  %v4535_v2 = vpop.xlane.xlu1 %1046  ;;  %v3566_v16 = vpop.eup %3565 }
 0x281   : > { %1803 = vadd.xlane.f32.xlu1 %v1802_v23  ;;  %v1409_v23 = vadd.f32 %v4180_v63, %v4231_v27  ;;  %v1713_v55 = vmul.f32 %v3566_v16, %v4236_v28 }
 0x283   : > { %3579 = vtanh.f32 %v1409_v23  ;;  %v1979_v43 = vsel %vm695_vm1, %v1713_v55, 0.0 }
 0x284   : > { %2124 = vadd.xlane.f32.xlu0 %v2123_v31  ;;  %v3568_v31 = vpop.eup %3567  ;;  %3581 = vtanh.f32 %v1433_v11 }
 0x285   : > { %1899 = vadd.xlane.f32.xlu1 %v1898_v38  ;;  %v3570_v14 = vpop.eup %3569  ;;  %v2293_v38 = vadd.s32 4294967288, %v4548_v18  ;;  %3583 = vtanh.f32 %v1441_v39  ;;  %v1388_v39 = vadd.f32 %v4239_v30, %v4177_v62 }
 0x286   : > { %v3572_v42 = vpop.eup %3571  ;;  %3585 = vtanh.f32 %v1481_v4 }
 0x287   : > { %v3574_v45 = vpop.eup %3573  ;;  %v4578_v49 = vsub.s32 %v2293_v38, %v4103_v56  ;;  %v1753_v52 = vmul.f32 %v3572_v42, %v4236_v28  ;;  %3587 = vtanh.f32 %v1394_v48 }
 0x288   : > { %1833 = vadd.xlane.f32.xlu0 %v1832_v41  ;;  %v1705_v41 = vmul.f32 %v3568_v31, %v4236_v28  ;;  %v1648_v59 = vmul.f32 %v3574_v45, %v4236_v28  ;;  %3589 = vtanh.f32 %v1473_v25  ;;  %v4607_v31 = vld [vmem:[%s5509_s12] ss:$0 sm:$0xff] }
 0x289   : > { %1995 = vadd.xlane.f32.xlu1 %v1994_v44  ;;  %v1745_v44 = vmul.f32 %v3570_v14, %v4236_v28  ;;  %v2099_v23 = vsel %vm695_vm1, %v1753_v52, 0.0  ;;  %3591 = vtanh.f32 %v1426_v8 }
 0x28a   : > { %v1955_v22 = vsel %vm695_vm1, %v1705_v41, 0.0  ;;  %v1784_v11 = vsel %vm695_vm1, %v1648_v59, 0.0  ;;  %3593 = vtanh.f32 %v1489_v12  ;;  %v1436_v59 = vadd.f32 %v4239_v30, %v4191_v3 }
 0x28b   : > { %v2075_v58 = vsel %vm695_vm1, %v1745_v44, 0.0 }
 0x28c   : > { %1977 = vadd.xlane.f32.xlu0 %v1976_v50 }
 0x28d   : > { %2091 = vadd.xlane.f32.xlu1 %v2090_v54  ;;  %v3576_v54 = vpop.eup %3575 }
 0x28e   : > { %v3578_v6 = vpop.eup %3577 }
 0x28f   : > { %v3580_v57 = vpop.eup %3579 }
 0x290   : > { %2025 = vadd.xlane.f32.xlu0 %v2024_v20  ;;  %v3582_v55 = vpop.eup %3581  ;;  %v1672_v42 = vmul.f32 %v4607_v31, %v3580_v57 }
 0x291   : > { %1788 = vadd.xlane.f32.xlu1 %v1787_v13  ;;  %v4545_v21 = vpop.xlane.xlu0 %1776  ;;  %v3828_v13 = vmov 1   ;;  %v1696_v45 = vmul.f32 %v4607_v31, %v3582_v55  ;;  %v1393_v55 = vadd.f32 %v4177_v62, %v4231_v27 }
 0x292   : > { %v4550_v19 = vpop.xlane.xlu1 %1824  ;;  %3407 = vset.pattern.permute.xlu1 %v3828_v13  ;;  %v2297_v15 = vrot.slane %v4545_v21, %v4578_v49  ;;  %v1856_v12 = vsel %vm695_vm1, %v1672_v42, 0.0 }
 0x294   : > { %2121 = vadd.xlane.f32.xlu0 %v2120_v29  ;;  %v1769_v29 = vmul.f32 %v3576_v54, %v4236_v28  ;;  %v1458_v28 = vadd.f32 %v4229_v26, %v4211_v17 }
 0x295   : > { %1932 = vadd.xlane.f32.xlu1 %v1931_v35  ;;  %v4560_v37 = vpop.xlane.xlu0 %1872  ;;  %v1680_v35 = vmul.f32 %v4607_v31, %v3578_v6 }
 0x296   : > { %v4563_v5 = vpop.xlane.xlu1 %2016  ;;  %v2147_v4 = vsel %vm695_vm1, %v1769_v29, 0.0  ;;  %3595 = vtanh.f32 %v1458_v28  ;;  %v2484_v8 = vrot.slane %v4560_v37, %v4578_v49  ;;  %v1468_v29 = vadd.f32 %v4239_v30, %v4187_v1 }
 0x297   : > { %v1880_v44 = vsel %vm695_vm1, %v1680_v35, 0.0  ;;  %v2721_v52 = vrot.slane %v4563_v5, %v4578_v49  ;;  %3597 = vtanh.f32 %v1388_v39 }
 0x298   : > { %1860 = vadd.xlane.f32.xlu0 %v1859_v40  ;;  %v2405_v40 = vrot.slane %v4550_v19, %v4578_v49  ;;  %v1474_v19 = vadd.f32 %v4229_v26, %v4187_v1 }
 0x299   : > { %1980 = vadd.xlane.f32.xlu1 %v1979_v43  ;;  %v4573_v46 = vpop.xlane.xlu0 %1920  ;;  %v3584_v43 = vpop.eup %3583 }
 0x29a   : > { %v4580_v50 = vpop.xlane.xlu1 %2064  ;;  %v3586_v48 = vpop.eup %3585  ;;  %v1704_v26 = vmul.f32 %v4607_v31, %v3584_v43  ;;  %3599 = vtanh.f32 %v1474_v19 }
 0x29b   : > { %v3588_v6 = vpop.eup %3587  ;;  %v2800_v57 = vrot.slane %v4580_v50, %v4578_v49  ;;  %3601 = vtanh.f32 %v1436_v59 }
 0x29c   : > { %1956 = vadd.xlane.f32.xlu0 %v1955_v22  ;;  %v3590_v13 = vpop.eup %3589  ;;  %v1657_v43 = vmul.f32 %v4607_v31, %v3588_v6  ;;  %3603 = vtanh.f32 %v1468_v29 }
 0x29d   : > { %2076 = vadd.xlane.f32.xlu1 %v2075_v58  ;;  %v4592_v20 = vpop.xlane.xlu0 %1968  ;;  %v3592_v28 = vpop.eup %3591  ;;  %3605 = vtanh.f32 %v1393_v55 }
 0x29e   : > { %v1774_v9 = vpop.xlane.xlu1 %1773 }
 0x29f   : > { %v2292_v16 = vrot.slane %v1774_v9, %v4587_v51 }
 0x2a0   : > { %2100 = vadd.xlane.f32.xlu0 %v2099_v23 }
 0x2a1   : > { %v4611_v21 = vsel %vm2298_vm4, %v2297_v15, %v2292_v16  ;;  %1785 = vadd.xlane.f32.xlu1 %v1784_v11  ;;  %v4613_v14 = vpop.xlane.xlu0 %2112  ;;  %v1928_v15 = vsel %vm695_vm1, %v1696_v45, 0.0  ;;  %v1744_v16 = vmul.f32 %v4607_v31, %v3586_v48  ;;  %v1500_v45 = vadd.f32 %v4239_v30, %v4225_v24 }
 0x2a2   : > { %v1822_v38 = vpop.xlane.xlu1 %1821 }
 0x2a3   : > { %v2401_v41 = vrot.slane %v1822_v38, %v4587_v51  ;;  %v2563_v38 = vrot.slane %v4573_v46, %v4578_v49  ;;  %v2072_v42 = vsel %vm695_vm1, %v1744_v16, 0.0  ;;  %3607 = vtanh.f32 %v1500_v45 }
 0x2a4   : > { %2148 = vadd.xlane.f32.xlu0 %v2147_v4  ;;  %v3594_v4 = vpop.eup %3593 }
 0x2a5   : > { %v4627_v25 = vsel %vm2298_vm4, %v2405_v40, %v2401_v41  ;;  %1881 = vadd.xlane.f32.xlu1 %v1880_v44  ;;  %v2014_v22 = vpop.xlane.xlu0 %2013  ;;  %v1952_v40 = vsel %vm695_vm1, %v1704_v26, 0.0  ;;  %v1736_v41 = vmul.f32 %v4607_v31, %v3590_v13  ;;  %v3596_v19 = vpop.eup %3595  ;;  %v1752_v59 = vmul.f32 %v4607_v31, %v3594_v4 }
 0x2a6   : > { %v2717_v54 = vrot.slane %v2014_v22, %v4587_v51  ;;  %v1870_v58 = vpop.xlane.xlu1 %1869  ;;  %v1425_v22 = vadd.f32 %v4183_v0, %v4231_v27  ;;  %v3598_v6 = vpop.eup %3597  ;;  %v1387_v13 = vadd.f32 %v4177_v62, %v4243_v32  ;;  %v1505_v4 = vadd.f32 %v4225_v24, %v4231_v27 }
 0x2a7   : > { %v2480_v9 = vrot.slane %v1870_v58, %v4587_v51  ;;  %v2048_v58 = vsel %vm695_vm1, %v1736_v41, 0.0  ;;  %v3600_v16 = vpop.eup %3599 }
 0x2a8   : > { %v4642_v5 = vsel %vm2298_vm4, %v2721_v52, %v2717_v54  ;;  %1857 = vadd.xlane.f32.xlu0 %v1856_v12  ;;  %v2642_v52 = vrot.slane %v4592_v20, %v4578_v49  ;;  %3609 = vtanh.f32 %v1425_v22  ;;  %v1737_v45 = vmul.f32 %v4607_v31, %v3600_v16 }
 0x2a9   : > { %v4647_v23 = vsel %vm2298_vm4, %v2484_v8, %v2480_v9  ;;  %1929 = vadd.xlane.f32.xlu1 %v1928_v15  ;;  %v2062_v37 = vpop.xlane.xlu0 %2061  ;;  %v1811_v8 = vsel %vm695_vm1, %v1657_v43, 0.0  ;;  %v1689_v9 = vmul.f32 %v4607_v31, %v3592_v28  ;;  %v1457_v15 = vadd.f32 %v4211_v17, %v4231_v27 }
 0x2aa   : > { %v2796_v11 = vrot.slane %v2062_v37, %v4587_v51  ;;  %v1918_v35 = vpop.xlane.xlu1 %1917  ;;  %v2879_v37 = vrot.slane %v4613_v14, %v4578_v49  ;;  %v1721_v28 = vmul.f32 %v4607_v31, %v3596_v19  ;;  %3611 = vtanh.f32 %v1387_v13 }
 0x2ab   : > { %v2559_v39 = vrot.slane %v1918_v35, %v4587_v51  ;;  %v3602_v35 = vpop.eup %3601  ;;  %v1907_v55 = vsel %vm695_vm1, %v1689_v9, 0.0  ;;  %v1419_v49 = vadd.f32 %v4183_v0, %v4243_v32  ;;  %3613 = vtanh.f32 %v1457_v15 }
 0x2ac   : > { %v4662_v50 = vsel %vm2298_vm4, %v2800_v57, %v2796_v11  ;;  %1953 = vadd.xlane.f32.xlu0 %v1952_v40  ;;  %v2096_v57 = vsel %vm695_vm1, %v1752_v59, 0.0  ;;  %v1651_v11 = vmul.f32 %v4607_v31, %v3598_v6  ;;  %v1699_v41 = vmul.f32 %v4607_v31, %v3602_v35 }
 0x2ad   : > { %v4667_v44 = vsel %vm2298_vm4, %v2563_v38, %v2559_v39  ;;  %2073 = vadd.xlane.f32.xlu1 %v2072_v42  ;;  %v4669_v46 = vpop.xlane.xlu0 %1848  ;;  %v2003_v43 = vsel %vm695_vm1, %v1721_v28, 0.0  ;;  %3615 = vtanh.f32 %v1419_v49  ;;  %v1435_v19 = vadd.f32 %v4191_v3, %v4243_v32 }
 0x2ae   : > { %v1966_v48 = vpop.xlane.xlu1 %1965  ;;  %v1793_v14 = vsel %vm695_vm1, %v1651_v11, 0.0  ;;  %3617 = vtanh.f32 %v1505_v4  ;;  %v2051_v6 = vsel %vm695_vm1, %v1737_v45, 0.0  ;;  %v1467_v13 = vadd.f32 %v4187_v1, %v4243_v32 }
 0x2af   : > { %v2638_v54 = vrot.slane %v1966_v48, %v4587_v51  ;;  %3619 = vtanh.f32 %v1435_v19  ;;  %v1499_v49 = vadd.f32 %v4225_v24, %v4243_v32 }
 0x2b0   : > { %2049 = vadd.xlane.f32.xlu0 %v2048_v58  ;;  %v1404_v58 = vadd.f32 %v4239_v30, %v4180_v63 }
 0x2b1   : > { %v4683_v12 = vsel %vm2298_vm4, %v2642_v52, %v2638_v54  ;;  %1812 = vadd.xlane.f32.xlu1 %v1811_v8  ;;  %v4685_v26 = vpop.xlane.xlu0 %1944  ;;  %v1937_v54 = vsel %vm695_vm1, %v1699_v41, 0.0  ;;  %v1452_v41 = vadd.f32 %v4239_v30, %v4211_v17 }
 0x2b2   : > { %v2110_v20 = vpop.xlane.xlu1 %2109  ;;  %3621 = vtanh.f32 %v1404_v58 }
 0x2b3   : > { %v2875_v29 = vrot.slane %v2110_v20, %v4587_v51  ;;  %v3604_v51 = vpop.eup %3603  ;;  %3623 = vtanh.f32 %v1467_v13 }
 0x2b4   : > { %2097 = vadd.xlane.f32.xlu0 %v2096_v57  ;;  %v3606_v42 = vpop.eup %3605  ;;  %v1731_v27 = vmul.f32 %v4607_v31, %v3604_v51 }
 0x2b5   : > { %v4699_v38 = vsel %vm2298_vm4, %v2879_v37, %v2875_v29  ;;  %1908 = vadd.xlane.f32.xlu1 %v1907_v55  ;;  %v4701_v39 = vpop.xlane.xlu0 %2040  ;;  %v3608_v52 = vpop.eup %3607  ;;  %v1656_v8 = vmul.f32 %v4607_v31, %v3606_v42  ;;  %v1420_v37 = vadd.f32 %v4239_v30, %v4183_v0  ;;  %vm2953_vm4 = vcmask 1042434  }
 0x2b6   : > { %v4703_v40 = vpop.xlane.xlu1 %1800  ;;  %v3610_v59 = vpop.eup %3609  ;;  %v2033_v15 = vsel %vm695_vm1, %v1731_v27, 0.0  ;;  %v1763_v16 = vmul.f32 %v4607_v31, %v3608_v52 }
 0x2b7   : > { %v3612_v29 = vpop.eup %3611  ;;  %v1808_v57 = vsel %vm695_vm1, %v1656_v8, 0.0  ;;  %v1688_v11 = vmul.f32 %v4607_v31, %v3610_v59  ;;  %3625 = vtanh.f32 %v1420_v37  ;;  %v1484_v59 = vadd.f32 %v4239_v30, %v4201_v10 }
 0x2b8   : > { %1794 = vadd.xlane.f32.xlu0 %v1793_v14  ;;  %v3614_v35 = vpop.eup %3613  ;;  %v2129_v51 = vsel %vm695_vm1, %v1763_v16, 0.0  ;;  %v1650_v14 = vmul.f32 %v4607_v31, %v3612_v29  ;;  %3627 = vtanh.f32 %v1499_v49  ;;  %v1460_v29 = vadd.f32 %v4245_v34, %v4211_v17 }
 0x2b9   : > { %2004 = vadd.xlane.f32.xlu1 %v2003_v43  ;;  %v4713_v48 = vpop.xlane.xlu0 %2136  ;;  %v3616_v4 = vpop.eup %3615  ;;  %v1904_v42 = vsel %vm695_vm1, %v1688_v11, 0.0  ;;  %v1720_v43 = vmul.f32 %v4607_v31, %v3614_v35  ;;  %3629 = vtanh.f32 %v1452_v41  ;;  %v1403_v11 = vadd.f32 %v4180_v63, %v4243_v32 }
 0x2ba   : > { %v4715_v22 = vpop.xlane.xlu1 %1896  ;;  %v3618_v45 = vpop.eup %3617  ;;  %v1790_v27 = vsel %vm695_vm1, %v1650_v14, 0.0  ;;  %v1682_v58 = vmul.f32 %v4607_v31, %v3616_v4 }
 0x2bb   : > { %v2000_v8 = vsel %vm695_vm1, %v1720_v43, 0.0  ;;  %v1768_v13 = vmul.f32 %v4607_v31, %v3618_v45 }
 0x2bc   : > { %1938 = vadd.xlane.f32.xlu0 %v1937_v54  ;;  %v1412_v54 = vadd.f32 %v4245_v34, %v4180_v63 }
 0x2bd   : > { %2052 = vadd.xlane.f32.xlu1 %v2051_v6  ;;  %v4725_v9 = vpop.xlane.xlu0 %1845  ;;  %v3620_v6 = vpop.eup %3619  ;;  %v2144_v49 = vsel %vm695_vm1, %v1768_v13, 0.0 }
 0x2be   : > { %v4727_v20 = vpop.xlane.xlu1 %1992  ;;  %3631 = vtanh.f32 %v1412_v54  ;;  %v1698_v30 = vmul.f32 %v4607_v31, %v3620_v6  ;;  %v1451_v54 = vadd.f32 %v4211_v17, %v4243_v32 }
 0x2bf   : > { %5537 = vst [vmem:[#allocation18_spill] sm:$0xff] %v4727_v20  ;;  %3633 = vtanh.f32 %v1484_v59 }
 0x2c0   : > { %2034 = vadd.xlane.f32.xlu0 %v2033_v15  ;;  %v3622_v15 = vpop.eup %3621  ;;  %3635 = vtanh.f32 %v1460_v29  ;;  %v1934_v43 = vsel %vm695_vm1, %v1698_v30, 0.0  ;;  %v1411_v29 = vadd.f32 %v4180_v63, %v4247_v36 }
 0x2c1   : > { %1809 = vadd.xlane.f32.xlu1 %v1808_v57  ;;  %v4737_v55 = vpop.xlane.xlu0 %1941  ;;  %v1886_v57 = vsel %vm695_vm1, %v1682_v58, 0.0  ;;  %v3624_v35 = vpop.eup %3623  ;;  %3637 = vtanh.f32 %v1403_v11  ;;  %v1483_v11 = vadd.f32 %v4201_v10, %v4243_v32 }
 0x2c2   : > { %v4739_v28 = vpop.xlane.xlu1 %2088  ;;  %v3626_v14 = vpop.eup %3625  ;;  %v1730_v45 = vmul.f32 %v4607_v31, %v3624_v35 }
 0x2c3   : > { %5538 = vst [vmem:[#allocation19_spill] sm:$0xff] %v4739_v28  ;;  %v1683_v59 = vmul.f32 %v4607_v31, %v3626_v14 }
 0x2c4   : > { %2130 = vadd.xlane.f32.xlu0 %v2129_v51  ;;  %v1667_v51 = vmul.f32 %v4607_v31, %v3622_v15  ;;  %v2300_v15 = vadd.s32 4294967280, %v4548_v18 }
 0x2c5   : > { %1905 = vadd.xlane.f32.xlu1 %v1904_v42  ;;  %v4749_v19 = vpop.xlane.xlu0 %2037  ;;  %v1476_v42 = vadd.f32 %v4245_v34, %v4187_v1 }
 0x2c6   : > { %v4751_v52 = vpop.xlane.xlu1 %1797  ;;  %v1841_v58 = vsel %vm695_vm1, %v1667_v51, 0.0  ;;  %v4803_v63 = vsub.s32 %v2300_v15, %v4103_v56 }
 0x2c7   : > { %3639 = vtanh.f32 %v1476_v42 }
 0x2c8   : > { %1791 = vadd.xlane.f32.xlu0 %v1790_v27  ;;  %v3628_v27 = vpop.eup %3627  ;;  %3641 = vtanh.f32 %v1451_v54 }
 0x2c9   : > { %2001 = vadd.xlane.f32.xlu1 %v2000_v8  ;;  %v4761_v16 = vpop.xlane.xlu0 %2133  ;;  %v3630_v6 = vpop.eup %3629  ;;  %v1762_v30 = vmul.f32 %v4607_v31, %v3628_v27  ;;  %3643 = vtanh.f32 %v1411_v29  ;;  %v1396_v27 = vadd.f32 %v4245_v34, %v4177_v62 }
 0x2ca   : > { %v4763_v37 = vpop.xlane.xlu1 %1893  ;;  %v3632_v35 = vpop.eup %3631  ;;  %v1715_v51 = vmul.f32 %v4607_v31, %v3630_v6  ;;  %3645 = vtanh.f32 %v1483_v11 }
 0x2cb   : > { %v3634_v14 = vpop.eup %3633  ;;  %v2126_v32 = vsel %vm695_vm1, %v1762_v30, 0.0  ;;  %v1675_v54 = vmul.f32 %v4607_v31, %v3632_v35  ;;  %v1459_v30 = vadd.f32 %v4211_v17, %v4247_v36 }
 0x2cc   : > { %1887 = vadd.xlane.f32.xlu0 %v1886_v57  ;;  %v2030_v57 = vsel %vm695_vm1, %v1730_v45, 0.0  ;;  %v1443_v45 = vadd.f32 %v4191_v3, %v4247_v36  ;;  %v1747_v6 = vmul.f32 %v4607_v31, %v3634_v14 }
 0x2cd   : > { %2145 = vadd.xlane.f32.xlu1 %v2144_v49  ;;  %v4773_v41 = vpop.xlane.xlu0 %1926  ;;  %v1889_v49 = vsel %vm695_vm1, %v1683_v59, 0.0  ;;  %v1985_v59 = vsel %vm695_vm1, %v1715_v51, 0.0  ;;  %v1865_v11 = vsel %vm695_vm1, %v1675_v54, 0.0  ;;  %v1428_v51 = vadd.f32 %v4245_v34, %v4183_v0 }
 0x2ce   : > { %v4775_v4 = vpop.xlane.xlu1 %1989  ;;  %3647 = vtanh.f32 %v1443_v45 }
 0x2cf   : > { %3649 = vtanh.f32 %v1396_v27  ;;  %v1507_v27 = vadd.f32 %v4225_v24, %v4247_v36 }
 0x2d0   : > { %1935 = vadd.xlane.f32.xlu0 %v1934_v43  ;;  %3651 = vtanh.f32 %v1459_v30 }
 0x2d1   : > { %1842 = vadd.xlane.f32.xlu1 %v1841_v58  ;;  %v4785_v8 = vpop.xlane.xlu0 %1974  ;;  %v3636_v58 = vpop.eup %3635  ;;  %3653 = vtanh.f32 %v1428_v51 }
 0x2d2   : > { %v4787_v13 = vpop.xlane.xlu1 %2085  ;;  %v3638_v15 = vpop.eup %3637  ;;  %v1723_v35 = vmul.f32 %v4607_v31, %v3636_v58  ;;  %3655 = vtanh.f32 %v1507_v27 }
 0x2d3   : > { %5539 = vst [vmem:[#allocation20_spill] sm:$0xff] %v4787_v13  ;;  %v3640_v14 = vpop.eup %3639  ;;  %v1666_v45 = vmul.f32 %v4607_v31, %v3638_v15 }
 0x2d4   : > { %2031 = vadd.xlane.f32.xlu0 %v2030_v57  ;;  %v2009_v7 = vsel %vm695_vm1, %v1723_v35, 0.0 }
 0x2d5   : > { %1890 = vadd.xlane.f32.xlu1 %v1889_v49  ;;  %v4798_v42 = vpop.xlane.xlu0 %2118 }
 0x2d6   : > { %v4800_v43 = vpop.xlane.xlu1 %1782 }
 0x2d8   : > { %2127 = vadd.xlane.f32.xlu0 %v2126_v32 }
 0x2d9   : > { %1986 = vadd.xlane.f32.xlu1 %v1985_v59  ;;  %v1876_v29 = vpop.xlane.xlu0 %1875  ;;  %v2081_v59 = vsel %vm695_vm1, %v1747_v6, 0.0  ;;  %v1444_v6 = vadd.f32 %v4245_v34, %v4191_v3  ;;  %v1492_v3 = vadd.f32 %v4245_v34, %v4201_v10 }
 0x2da   : > { %v2489_v57 = vrot.slane %v1876_v29, %v4803_v63  ;;  %v4814_v49 = vpop.xlane.xlu1 %1830  ;;  %v3642_v29 = vpop.eup %3641 }
 0x2db   : > { %v3644_v15 = vpop.eup %3643  ;;  %v1714_v30 = vmul.f32 %v4607_v31, %v3642_v29  ;;  %3657 = vtanh.f32 %v1444_v6  ;;  %v1395_v6 = vadd.f32 %v4177_v62, %v4247_v36 }
 0x2dc   : > { %v4824_v32 = vsel %vm2305_vm5, %v2489_v57, %v4647_v23  ;;  %1866 = vadd.xlane.f32.xlu0 %v1865_v11  ;;  %v1739_v23 = vmul.f32 %v4607_v31, %v3640_v14  ;;  %v1838_v11 = vsel %vm695_vm1, %v1666_v45, 0.0  ;;  %v1674_v45 = vmul.f32 %v4607_v31, %v3644_v15 }
 0x2dd   : > { %2082 = vadd.xlane.f32.xlu1 %v2081_v59  ;;  %v1924_v17 = vpop.xlane.xlu0 %1923  ;;  %v3646_v59 = vpop.eup %3645  ;;  %3659 = vtanh.f32 %v1492_v3 }
 0x2de   : > { %v2568_v54 = vrot.slane %v1924_v17, %v4803_v63  ;;  %v4829_v58 = vpop.xlane.xlu1 %1878  ;;  %v2307_v17 = vadd.s32 4294967272, %v4548_v18  ;;  %3661 = vtanh.f32 %v1395_v6  ;;  %v1475_v6 = vadd.f32 %v4187_v1, %v4247_v36 }
 0x2e0   : > { %v4839_v57 = vsel %vm2305_vm5, %v2568_v54, %v4667_v44  ;;  %2010 = vadd.xlane.f32.xlu0 %v2009_v7  ;;  %v2057_v44 = vsel %vm695_vm1, %v1739_v23, 0.0  ;;  %v3648_v7 = vpop.eup %3647  ;;  %v1982_v54 = vsel %vm695_vm1, %v1714_v30, 0.0  ;;  %v4856_v27 = vsub.s32 %v2307_v17, %v4103_v56 }
 0x2e1   : > { %1839 = vadd.xlane.f32.xlu1 %v1838_v11  ;;  %v2068_v35 = vpop.xlane.xlu0 %2067  ;;  %v1746_v11 = vmul.f32 %v4607_v31, %v3646_v59  ;;  %v1862_v30 = vsel %vm695_vm1, %v1674_v45, 0.0  ;;  %v1706_v59 = vmul.f32 %v4607_v31, %v3648_v7  ;;  %v1427_v7 = vadd.f32 %v4183_v0, %v4247_v36 }
 0x2e2   : > { %v2805_v51 = vrot.slane %v2068_v35, %v4803_v63  ;;  %v4845_v14 = vpop.xlane.xlu1 %2022  ;;  %v3650_v35 = vpop.eup %3649 }
 0x2e3   : > { %v3652_v17 = vpop.eup %3651  ;;  %v1659_v3 = vmul.f32 %v4607_v31, %v3650_v35  ;;  %3663 = vtanh.f32 %v1427_v7  ;;  %v1491_v7 = vadd.f32 %v4201_v10, %v4247_v36  ;;  %v1508_v36 = vadd.f32 %v4245_v34, %v4225_v24 }
 0x2e4   : > { %v2806_v29 = vsel %vm2305_vm5, %v2805_v51, %v4662_v50  ;;  %2058 = vadd.xlane.f32.xlu0 %v2057_v44  ;;  %v2889_v50 = vrot.slane %v4798_v42, %v4856_v27  ;;  %v3654_v62 = vpop.eup %3653  ;;  %3665 = vtanh.f32 %v1475_v6 }
 0x2e5   : > { %1983 = vadd.xlane.f32.xlu1 %v1982_v54  ;;  %v2116_v28 = vpop.xlane.xlu0 %2115  ;;  %v1958_v54 = vsel %vm695_vm1, %v1706_v59, 0.0  ;;  %v3656_v35 = vpop.eup %3655  ;;  %3667 = vtanh.f32 %v1491_v7 }
 0x2e6   : > { %v2884_v23 = vrot.slane %v2116_v28, %v4803_v63  ;;  %v2071_v13 = vpop.xlane.xlu1 %2070  ;;  %v2078_v28 = vsel %vm695_vm1, %v1746_v11, 0.0  ;;  %v1722_v11 = vmul.f32 %v4607_v31, %v3652_v17  ;;  %3669 = vrcp.f32 %v4523_v47 }
 0x2e7   : > { %v2810_v15 = vrot.slane %v2071_v13, %v4856_v27  ;;  %3671 = vtanh.f32 %v1508_v36 }
 0x2e8   : > { %v2885_v51 = vsel %vm2305_vm5, %v2884_v23, %v4699_v38  ;;  %1863 = vadd.xlane.f32.xlu0 %v1862_v30  ;;  %v1817_v23 = vsel %vm695_vm1, %v1659_v3, 0.0 }
 0x2e9   : > { %v4871_v44 = vsel %vm2312_vm6, %v2810_v15, %v2806_v29  ;;  %2079 = vadd.xlane.f32.xlu1 %v2078_v28  ;;  %v4873_v13 = vpop.xlane.xlu0 %1854  ;;  %v4876_v42 = vsel %vm2312_vm6, %v2889_v50, %v2885_v51  ;;  %v2311_v29 = vrot.slane %v4800_v43, %v4856_v27  ;;  %v1691_v50 = vmul.f32 %v4607_v31, %v3654_v62  ;;  %v3658_v15 = vpop.eup %3657 }
 0x2ea   : > { %v1780_v45 = vpop.xlane.xlu1 %1779  ;;  %v2006_v51 = vsel %vm695_vm1, %v1722_v11, 0.0  ;;  %v1770_v28 = vmul.f32 %v4607_v31, %v3656_v35  ;;  %v3660_v3 = vpop.eup %3659  ;;  %v1707_v62 = vmul.f32 %v4607_v31, %v3658_v15  ;;  %v2652_v35 = vrot.slane %v4785_v8, %v4856_v27 }
 0x2eb   : > { %v2304_v38 = vrot.slane %v1780_v45, %v4803_v63 }
 0x2ec   : > { %1959 = vadd.xlane.f32.xlu0 %v1958_v54  ;;  %v2150_v11 = vsel %vm695_vm1, %v1770_v28, 0.0 }
 0x2ed   : > { %v2306_v0 = vsel %vm2305_vm5, %v2304_v38, %v4611_v21  ;;  %1818 = vadd.xlane.f32.xlu1 %v1817_v23  ;;  %v4889_v30 = vpop.xlane.xlu0 %1950  ;;  %v1913_v21 = vsel %vm695_vm1, %v1691_v50, 0.0  ;;  %v3662_v23 = vpop.eup %3661 }
 0x2ee   : > { %v1828_v59 = vpop.xlane.xlu1 %1827  ;;  %v4894_v17 = vsel %vm2312_vm6, %v2311_v29, %v2306_v0  ;;  %v1961_v29 = vsel %vm695_vm1, %v1707_v62, 0.0  ;;  %v1658_v6 = vmul.f32 %v4607_v31, %v3662_v23 }
 0x2ef   : > { %v2410_v43 = vrot.slane %v1828_v59, %v4803_v63 }
 0x2f0   : > { %2007 = vadd.xlane.f32.xlu0 %v2006_v51 }
 0x2f1   : > { %v4903_v45 = vsel %vm2305_vm5, %v2410_v43, %v4627_v25  ;;  %1914 = vadd.xlane.f32.xlu1 %v1913_v21  ;;  %v4905_v1 = vpop.xlane.xlu0 %2046  ;;  %v1755_v25 = vmul.f32 %v4607_v31, %v3660_v3  ;;  %v3664_v43 = vpop.eup %3663 }
 0x2f2   : > { %v1972_v38 = vpop.xlane.xlu1 %1971  ;;  %v1690_v24 = vmul.f32 %v4607_v31, %v3664_v43  ;;  %v3666_v34 = vpop.eup %3665 }
 0x2f3   : > { %v2647_v54 = vrot.slane %v1972_v38, %v4803_v63  ;;  %v2105_v8 = vsel %vm695_vm1, %v1755_v25, 0.0  ;;  %v1738_v62 = vmul.f32 %v4607_v31, %v3666_v34  ;;  %v3668_v38 = vpop.eup %3667 }
 0x2f4   : > { %2151 = vadd.xlane.f32.xlu0 %v2150_v11  ;;  %v3670_v11 = vpop.eup %3669 }
 0x2f5   : > { %v2648_v50 = vsel %vm2305_vm5, %v2647_v54, %v4683_v12  ;;  %1962 = vadd.xlane.f32.xlu1 %v1961_v29  ;;  %v4917_v15 = vpop.xlane.xlu0 %1851  ;;  %v2054_v7 = vsel %vm695_vm1, %v1738_v62, 0.0  ;;  %v3672_v29 = vpop.eup %3671 }
 0x2f6   : > { %v2020_v0 = vpop.xlane.xlu1 %2019  ;;  %v4920_v59 = vsel %vm2312_vm6, %v2652_v35, %v2648_v50  ;;  %v1754_v35 = vmul.f32 %v4607_v31, %v3668_v38  ;;  %v2415_v38 = vrot.slane %v4814_v49, %v4856_v27 }
 0x2f7   : > { %v2726_v10 = vrot.slane %v2020_v0, %v4803_v63  ;;  %v1814_v63 = vsel %vm695_vm1, %v1658_v6, 0.0  ;;  %v4954_v0 = vmul.f32 %v3670_v11, %v4158_v33  ;;  %v2321_v33 = vadd.s32 4294967256, %v4548_v18 }
 0x2f8   : > { %v2102_v50 = vsel %vm695_vm1, %v1754_v35, 0.0 }
 0x2f9   : > { %v4929_v12 = vsel %vm2305_vm5, %v2726_v10, %v4642_v5  ;;  %2106 = vadd.xlane.f32.xlu1 %v2105_v8  ;;  %v4931_v51 = vpop.xlane.xlu0 %1947  ;;  %v1910_v5 = vsel %vm695_vm1, %v1690_v24, 0.0  ;;  %5542 = vst [vmem:[#allocation23_spill] sm:$0xff] %v4954_v0  ;;  %v1771_v10 = vmul.f32 %v4607_v31, %v3672_v29  ;;  %v2314_v24 = vadd.s32 4294967264, %v4548_v18 }
 0x2fa   : > { %v4934_v28 = vpop.xlane.xlu1 %1806  ;;  %v4973_v62 = vsub.s32 %v2321_v33, %v4103_v56  ;;  %vm2955_vm5 = vcmask 1043459  }
 0x2fb   : > { %v2153_v6 = vsel %vm695_vm1, %v1771_v10, 0.0  ;;  %v4970_v31 = vsub.s32 %v2314_v24, %v4103_v56  ;;  %v2416_v10 = vsel %vm2312_vm6, %v2415_v38, %v4903_v45  ;;  %vm2389_vm1 = vcmask 982912  }
 0x2fd   : > { %1815 = vadd.xlane.f32.xlu1 %v1814_v63  ;;  %v4938_v3 = vpop.xlane.xlu0 %2043 }
 0x2fe   : > { %v4940_v21 = vpop.xlane.xlu1 %1902 }
 0x301   : > { %1911 = vadd.xlane.f32.xlu1 %v1910_v5  ;;  %v4944_v47 = vpop.xlane.xlu0 %2139 }
 0x302   : > { %v4946_v54 = vpop.xlane.xlu1 %1998 }
 0x303   : > { %5540 = vst [vmem:[#allocation21_spill] sm:$0xff] %v4946_v54 }
 0x305   : > { %2055 = vadd.xlane.f32.xlu1 %v2054_v7  ;;  %v1837_v25 = vpop.xlane.xlu0 %1836  ;;  %v954_v7 = vsub.f32 %v4172_v53, %v4533_v61 }
 0x306   : > { %v4950_v23 = vpop.xlane.xlu1 %2094 }
 0x307   : > { %5541 = vst [vmem:[#allocation22_spill] sm:$0xff] %v4950_v23  ;;  %v955_v33 = vmul.f32 1.442695, %v954_v7 }
 0x309   : > { %2103 = vadd.xlane.f32.xlu1 %v2102_v50  ;;  %v4957_v36 = vpop.xlane.xlu0 %1884  ;;  %v2425_v50 = vrot.slane %v1837_v25, %v4973_v62  ;;  %v2731_v25 = vrot.slane %v4845_v14, %v4856_v27  ;;  %3673 = vpow2.f32 %v955_v33 }
 0x30a   : > { %v4959_v8 = vpop.xlane.xlu1 %2142  ;;  %1069 = vperm.xlu0 %3406, %v4954_v0  }
 0x30b   : > { %v2732_v7 = vsel %vm2312_vm6, %v2731_v25, %v4929_v12 }
 0x30d   : > { %2154 = vadd.xlane.f32.xlu1 %v2153_v6  ;;  %v2029_v43 = vpop.xlane.xlu0 %2028 }
 0x30e   : > { %v4963_v63 = vpop.xlane.xlu1 %1803 }
 0x311   : > { %v2125_v34 = vpop.xlane.xlu0 %2124 }
 0x312   : > { %v4967_v5 = vpop.xlane.xlu1 %1899 }
 0x315   : > { %v1834_v11 = vpop.xlane.xlu0 %1833 }
 0x316   : > { %v2420_v35 = vrot.slane %v1834_v11, %v4970_v31  ;;  %v4980_v29 = vpop.xlane.xlu1 %1995 }
 0x317   : > { %5543 = vst [vmem:[#allocation24_spill] sm:$0xff] %v4980_v29 }
 0x318   : > { %v2421_v6 = vsel %vm2319_vm7, %v2420_v35, %v2416_v10  ;;  %v2741_v35 = vrot.slane %v2029_v43, %v4973_v62 }
 0x319   : > { %v1978_v24 = vpop.xlane.xlu0 %1977  ;;  %v4987_v49 = vsel %vm2326_vm8, %v2425_v50, %v2421_v6 }
 0x31a   : > { %v2657_v23 = vrot.slane %v1978_v24, %v4970_v31  ;;  %v4990_v53 = vpop.xlane.xlu1 %2091  ;;  %v2899_v24 = vrot.slane %v2125_v34, %v4973_v62 }
 0x31b   : > { %5544 = vst [vmem:[#allocation25_spill] sm:$0xff] %v4990_v53 }
 0x31c   : > { %v2658_v61 = vsel %vm2319_vm7, %v2657_v23, %v4920_v59  ;;  %v3829_v23 = vmov 2  }
 0x31d   : > { %v2026_v11 = vpop.xlane.xlu0 %2025  ;;  %3408 = vset.pattern.permute.xlu0 %v3829_v23 }
 0x31e   : > { %v2736_v45 = vrot.slane %v2026_v11, %v4970_v31  ;;  %v1789_v38 = vpop.xlane.xlu1 %1788  ;;  %1075 = vperm.xlu1 %3407, %v4954_v0  }
 0x320   : > { %v2737_v50 = vsel %vm2319_vm7, %v2736_v45, %v2732_v7  ;;  %v5015_v45 = vpop.eup %3673 }
 0x321   : > { %v2122_v10 = vpop.xlane.xlu0 %2121  ;;  %v5003_v59 = vsel %vm2326_vm8, %v2741_v35, %v2737_v50  ;;  %5546 = vst [vmem:[#allocation27_spill] sm:$0xff] %v5015_v45 }
 0x322   : > { %v2894_v14 = vrot.slane %v2122_v10, %v4970_v31  ;;  %v1933_v6 = vpop.xlane.xlu1 %1932  ;;  %v1048_v10 = vsub.f32 %v4174_v60, %v4535_v2  ;;  %v2504_v2 = vrot.slane %v4957_v36, %v4973_v62 }
 0x324   : > { %v2895_v33 = vsel %vm2319_vm7, %v2894_v14, %v4876_v42  ;;  %v2494_v14 = vrot.slane %v4829_v58, %v4856_v27 }
 0x325   : > { %v5009_v43 = vpop.xlane.xlu0 %1860  ;;  %v5012_v12 = vsel %vm2326_vm8, %v2899_v24, %v2895_v33  ;;  %v2325_v24 = vrot.slane %v1789_v38, %v4973_v62 }
 0x326   : > { %5545 = vst [vmem:[#allocation26_spill] sm:$0xff] %v5009_v43  ;;  %v1981_v25 = vpop.xlane.xlu1 %1980  ;;  %v2495_v60 = vsel %vm2312_vm6, %v2494_v14, %v4824_v32 }
 0x327   : > { %v2662_v11 = vrot.slane %v1981_v25, %v4973_v62 }
 0x329   : > { %v5018_v35 = vsel %vm2326_vm8, %v2662_v11, %v2658_v61  ;;  %v5020_v7 = vpop.xlane.xlu0 %1956  ;;  %957 = vadd.xlane.f32.xlu0 %v5015_v45  ;;  %v1049_v45 = vmul.f32 1.442695, %v1048_v10 }
 0x32a   : > { %5547 = vst [vmem:[#allocation28_spill] sm:$0xff] %v5018_v35  ;;  %v2077_v34 = vpop.xlane.xlu1 %2076 }
 0x32b   : > { %3675 = vpow2.f32 %v1049_v45 }
 0x32d   : > { %v5023_v50 = vpop.xlane.xlu0 %2100 }
 0x32e   : > { %5548 = vst [vmem:[#allocation29_spill] sm:$0xff] %v5023_v50  ;;  %v1786_v42 = vpop.xlane.xlu1 %1785  ;;  %v2356_v50 = vadd.s32 4294967216, %v4548_v18 }
 0x32f   : > { %v2318_v23 = vrot.slane %v1786_v42, %v4970_v31 }
 0x330   : > { %v5119_v20 = vsub.s32 %v2356_v50, %v4103_v56 }
 0x331   : > { %v2320_v61 = vsel %vm2319_vm7, %v2318_v23, %v4894_v17  ;;  %v5033_v33 = vpop.xlane.xlu0 %2148  ;;  %v2573_v17 = vrot.slane %v4773_v41, %v4856_v27  ;;  %v2820_v27 = vrot.slane %v2077_v34, %v4973_v62 }
 0x332   : > { %v1882_v25 = vpop.xlane.xlu1 %1881  ;;  %v2327_v11 = vsel %vm2326_vm8, %v2325_v24, %v2320_v61  ;;  %v2583_v24 = vrot.slane %v1933_v6, %v4973_v62 }
 0x333   : > { %v2499_v0 = vrot.slane %v1882_v25, %v4970_v31  ;;  %v2574_v32 = vsel %vm2312_vm6, %v2573_v17, %v4839_v57  ;;  %vm2957_vm6 = vcmask 1044484  }
 0x335   : > { %v2500_v58 = vsel %vm2319_vm7, %v2499_v0, %v2495_v60  ;;  %v5042_v38 = vpop.xlane.xlu0 %1857  ;;  %v5070_v60 = vpop.eup %3675 }
 0x336   : > { %v1930_v42 = vpop.xlane.xlu1 %1929  ;;  %v5047_v23 = vsel %vm2326_vm8, %v2504_v2, %v2500_v58  ;;  %5550 = vst [vmem:[#allocation31_spill] sm:$0xff] %v5070_v60 }
 0x337   : > { %v2578_v10 = vrot.slane %v1930_v42, %v4970_v31 }
 0x339   : > { %v2579_v36 = vsel %vm2319_vm7, %v2578_v10, %v2574_v32  ;;  %v5054_v0 = vpop.xlane.xlu0 %1953  ;;  %v2328_v10 = vadd.s32 4294967248, %v4548_v18 }
 0x33a   : > { %v2074_v14 = vpop.xlane.xlu1 %2073  ;;  %v5057_v61 = vsel %vm2326_vm8, %v2583_v24, %v2579_v36  ;;  %v2335_v24 = vadd.s32 4294967240, %v4548_v18  ;;  %v2342_v36 = vadd.s32 4294967232, %v4548_v18 }
 0x33b   : > { %v2815_v41 = vrot.slane %v2074_v14, %v4970_v31 }
 0x33d   : > { %v2816_v45 = vsel %vm2319_vm7, %v2815_v41, %v4871_v44  ;;  %v5063_v25 = vpop.xlane.xlu0 %2049  ;;  %v5093_v41 = vsub.s32 %v2328_v10, %v4103_v56  ;;  %vm2959_vm7 = vcmask 1045509  }
 0x33e   : > { %v5065_v6 = vpop.xlane.xlu1 %1812  ;;  %v5068_v57 = vsel %vm2326_vm8, %v2820_v27, %v2816_v45  ;;  %v2349_v27 = vadd.s32 4294967224, %v4548_v18  ;;  %v2363_v45 = vadd.s32 4294967208, %v4548_v18  ;;  %vm2961_vm8 = vcmask 1046534  }
 0x33f   : > { %5549 = vst [vmem:[#allocation30_spill] sm:$0xff] %v5068_v57  ;;  %v2370_v57 = vadd.s32 4294967200, %v4548_v18 }
 0x340   : > { %v5110_v29 = vsub.s32 %v2349_v27, %v4103_v56 }
 0x341   : > { %v5072_v2 = vpop.xlane.xlu0 %2097 }
 0x342   : > { %5551 = vst [vmem:[#allocation32_spill] sm:$0xff] %v5072_v2  ;;  %v5074_v58 = vpop.xlane.xlu1 %1908  ;;  %1051 = vadd.xlane.f32.xlu1 %v5070_v60  ;;  %v5098_v60 = vsub.s32 %v2335_v24, %v4103_v56  ;;  %v2377_v2 = vadd.s32 4294967192, %v4548_v18  ;;  %v5113_v24 = vsub.s32 %v2363_v45, %v4103_v56  ;;  %v2353_v18 = vrot.slane %v4703_v40, %v5110_v29 }
 0x343   : > { %v2603_v40 = vrot.slane %v4685_v26, %v5110_v29  ;;  %v2524_v26 = vrot.slane %v4715_v22, %v5110_v29 }
 0x344   : > { %v5125_v27 = vsub.s32 %v2377_v2, %v4103_v56 }
 0x345   : > { %v1795_v31 = vpop.xlane.xlu0 %1794 }
 0x346   : > { %v5077_v62 = vpop.xlane.xlu1 %2004  ;;  %v2339_v43 = vrot.slane %v1795_v31, %v5098_v60  ;;  %v2360_v31 = vrot.slane %v4963_v63, %v5119_v20  ;;  %v2761_v63 = vrot.slane %v4701_v39, %v5110_v29 }
 0x347   : > { %5552 = vst [vmem:[#allocation33_spill] sm:$0xff] %v5077_v62  ;;  %v5103_v62 = vsub.s32 %v2342_v36, %v4103_v56 }
 0x349   : > { %v5079_v34 = vpop.xlane.xlu0 %1938  ;;  %v2346_v36 = vrot.slane %v4751_v52, %v5103_v62  ;;  %v5131_v52 = vsub.s32 %v2370_v57, %v4103_v56  ;;  %v2598_v39 = vrot.slane %v4737_v55, %v5103_v62  ;;  %v2914_v22 = vrot.slane %v4761_v16, %v5103_v62 }
 0x34a   : > { %v5081_v44 = vpop.xlane.xlu1 %2052 }
 0x34d   : > { %v5083_v17 = vpop.xlane.xlu0 %2034 }
 0x34e   : > { %v1810_v42 = vpop.xlane.xlu1 %1809 }
 0x34f   : > { %v2374_v57 = vrot.slane %v1810_v42, %v5131_v52  ;;  %v2756_v42 = vrot.slane %v4749_v19, %v5103_v62  ;;  %v2613_v19 = vrot.slane %v4889_v30, %v5113_v24 }
 0x351   : > { %v5087_v32 = vpop.xlane.xlu0 %2130 }
 0x352   : > { %v5090_v14 = vpop.xlane.xlu1 %1905 }
 0x355   : > { %v1792_v53 = vpop.xlane.xlu0 %1791 }
 0x356   : > { %v2332_v10 = vrot.slane %v1792_v53, %v5093_v41  ;;  %v5107_v54 = vpop.xlane.xlu1 %2001 }
 0x357   : > { %5553 = vst [vmem:[#allocation34_spill] sm:$0xff] %v5107_v54 }
 0x358   : > { %v2334_v53 = vsel %vm2333_vm9, %v2332_v10, %v2327_v11  ;;  %v2367_v11 = vrot.slane %v4934_v28, %v5113_v24  ;;  %v2919_v10 = vrot.slane %v4713_v48, %v5110_v29  ;;  %v2381_v28 = vrot.slane %v5065_v6, %v5125_v27 }
 0x359   : > { %v2341_v45 = vsel %vm2340_vm10, %v2339_v43, %v2334_v53  ;;  %v1888_v54 = vpop.xlane.xlu0 %1887  ;;  %v2519_v6 = vrot.slane %v4763_v37, %v5103_v62  ;;  %v2608_v37 = vrot.slane %v4931_v51, %v5119_v20 }
 0x35a   : > { %v2348_v50 = vsel %vm2347_vm11, %v2346_v36, %v2341_v45  ;;  %v5134_v35 = vpop.xlane.xlu1 %2145 }
 0x35b   : > { %v2355_v43 = vsel %vm2354_vm12, %v2353_v18, %v2348_v50  ;;  %v2593_v50 = vrot.slane %v5079_v34, %v5098_v60  ;;  %v2534_v34 = vrot.slane %v4940_v21, %v5113_v24  ;;  %v2618_v21 = vrot.slane %v5054_v0, %v5131_v52 }
 0x35c   : > { %v2362_v2 = vsel %vm2361_vm13, %v2360_v31, %v2355_v43  ;;  %v2509_v43 = vrot.slane %v1888_v54, %v5093_v41  ;;  %v2623_v54 = vrot.slane %v5020_v7, %v5125_v27  ;;  %v2544_v0 = vrot.slane %v5074_v58, %v5125_v27 }
 0x35d   : > { %v1936_v36 = vpop.xlane.xlu0 %1935  ;;  %v2369_v18 = vsel %vm2368_vm14, %v2367_v11, %v2362_v2  ;;  %v2771_v11 = vrot.slane %v4905_v1, %v5113_v24  ;;  %v2529_v1 = vrot.slane %v4967_v5, %v5119_v20  ;;  %v2776_v5 = vrot.slane %v5063_v25, %v5131_v52 }
 0x35e   : > { %v2588_v53 = vrot.slane %v1936_v36, %v5093_v41  ;;  %v5157_v45 = vpop.xlane.xlu1 %1842  ;;  %v2376_v31 = vsel %vm2375_vm15, %v2374_v57, %v2369_v18  ;;  %v2766_v57 = vrot.slane %v4938_v3, %v5119_v20  ;;  %v2751_v3 = vrot.slane %v5083_v17, %v5098_v60 }
 0x35f   : > { %v5167_v55 = vsel %vm2382_vm0, %v2381_v28, %v2376_v31  ;;  %v2510_v7 = vsel %vm2333_vm9, %v2509_v43, %v5047_v23 }
 0x360   : > { %v2589_v16 = vsel %vm2333_vm9, %v2588_v53, %v5057_v61 }
 0x361   : > { %v2594_v2 = vsel %vm2340_vm10, %v2593_v50, %v2589_v16  ;;  %v2032_v30 = vpop.xlane.xlu0 %2031 }
 0x362   : > { %v2599_v61 = vsel %vm2347_vm11, %v2598_v39, %v2594_v2  ;;  %v2746_v28 = vrot.slane %v2032_v30, %v5093_v41  ;;  %v1891_v51 = vpop.xlane.xlu1 %1890 }
 0x363   : > { %v2604_v36 = vsel %vm2354_vm12, %v2603_v40, %v2599_v61  ;;  %v2514_v18 = vrot.slane %v1891_v51, %v5098_v60 }
 0x364   : > { %v2747_v39 = vsel %vm2333_vm9, %v2746_v28, %v5003_v59  ;;  %v2609_v53 = vsel %vm2361_vm13, %v2608_v37, %v2604_v36  ;;  %v2909_v37 = vrot.slane %v5087_v32, %v5098_v60  ;;  %v2781_v32 = vrot.slane %v5081_v44, %v5125_v27 }
 0x365   : > { %v2752_v17 = vsel %vm2340_vm10, %v2751_v3, %v2747_v39  ;;  %v2515_v40 = vsel %vm2340_vm10, %v2514_v18, %v2510_v7  ;;  %v2128_v31 = vpop.xlane.xlu0 %2127  ;;  %v2614_v50 = vsel %vm2368_vm14, %v2613_v19, %v2609_v53  ;;  %v2924_v28 = vrot.slane %v4944_v47, %v5119_v20 }
 0x366   : > { %v2757_v25 = vsel %vm2347_vm11, %v2756_v42, %v2752_v17  ;;  %v2520_v16 = vsel %vm2347_vm11, %v2519_v6, %v2515_v40  ;;  %v2904_v23 = vrot.slane %v2128_v31, %v5093_v41  ;;  %v1987_v43 = vpop.xlane.xlu1 %1986  ;;  %v2619_v59 = vsel %vm2375_vm15, %v2618_v21, %v2614_v50 }
 0x367   : > { %v2762_v58 = vsel %vm2354_vm12, %v2761_v63, %v2757_v25  ;;  %v2525_v2 = vsel %vm2354_vm12, %v2524_v26, %v2520_v16  ;;  %v5216_v30 = vsel %vm2382_vm0, %v2623_v54, %v2619_v59  ;;  %v2539_v42 = vrot.slane %v5090_v14, %v5131_v52  ;;  %v5554_v25 = vld [vmem:[#allocation28_spill] sm:$0xff] }
 0x368   : > { %v2530_v6 = vsel %vm2361_vm13, %v2529_v1, %v2525_v2  ;;  %v2905_v19 = vsel %vm2333_vm9, %v2904_v23, %v5012_v12  ;;  %v2767_v61 = vsel %vm2361_vm13, %v2766_v57, %v2762_v58  ;;  %v2929_v57 = vrot.slane %v4959_v8, %v5113_v24  ;;  %v5555_v23 = vld [vmem:[#allocation18_spill] sm:$0xff] }
 0x369   : > { %v2910_v63 = vsel %vm2340_vm10, %v2909_v37, %v2905_v19  ;;  %v2535_v26 = vsel %vm2368_vm14, %v2534_v34, %v2530_v6  ;;  %v2772_v54 = vsel %vm2368_vm14, %v2771_v11, %v2767_v61  ;;  %v5248_v34 = vpop.xlane.xlu0 %1866  ;;  %v2939_v8 = vrot.slane %v5033_v33, %v5125_v27  ;;  %v5558_v61 = vld [vmem:[#allocation21_spill] sm:$0xff] }
 0x36a   : > { %v2915_v14 = vsel %vm2347_vm11, %v2914_v22, %v2910_v63  ;;  %v2083_v1 = vpop.xlane.xlu1 %2082  ;;  %v2540_v51 = vsel %vm2375_vm15, %v2539_v42, %v2535_v26  ;;  %v2777_v12 = vsel %vm2375_vm15, %v2776_v5, %v2772_v54  ;;  %v2934_v22 = vrot.slane %v5134_v35, %v5131_v52 }
 0x36b   : > { %v2920_v44 = vsel %vm2354_vm12, %v2919_v10, %v2915_v14  ;;  %v5241_v11 = vsel %vm2382_vm0, %v2544_v0, %v2540_v51  ;;  %v5244_v47 = vsel %vm2382_vm0, %v2781_v32, %v2777_v12  ;;  %v2435_v35 = vrot.slane %v5157_v45, %v5098_v60  ;;  %v5559_v14 = vld [vmem:[#allocation20_spill] sm:$0xff]  ;;  %v5560_v12 = vld [vmem:[#allocation34_spill] sm:$0xff] }
 0x36c   : > { %v2925_v21 = vsel %vm2361_vm13, %v2924_v28, %v2920_v44  ;;  %v2440_v5 = vrot.slane %v4725_v9, %v5103_v62  ;;  %v2445_v33 = vrot.slane %v4669_v46, %v5110_v29  ;;  %v2450_v17 = vrot.slane %v4917_v15, %v5119_v20 }
 0x36d   : > { %v2930_v48 = vsel %vm2368_vm14, %v2929_v57, %v2925_v21  ;;  %v5268_v53 = vpop.xlane.xlu0 %2010  ;;  %v2455_v9 = vrot.slane %v4873_v13, %v5113_v24  ;;  %v2677_v46 = vrot.slane %v4775_v4, %v5103_v62  ;;  %v2460_v50 = vrot.slane %v5042_v38, %v5131_v52  ;;  %v5556_v13 = vld [vmem:[#allocation26_spill] sm:$0xff]  ;;  %v5557_v4 = vld [vmem:[#allocation24_spill] sm:$0xff]  ;;  %v5562_v21 = vld [vmem:[#allocation19_spill] sm:$0xff] }
 0x36e   : > { %v1840_v3 = vpop.xlane.xlu1 %1839  ;;  %v2935_v10 = vsel %vm2375_vm15, %v2934_v22, %v2930_v48  ;;  %v2682_v59 = vrot.slane %v5555_v23, %v5110_v29  ;;  %v2465_v37 = vrot.slane %v5556_v13, %v5125_v27  ;;  %v2687_v42 = vrot.slane %v5557_v4, %v5119_v20 }
 0x36f   : > { %v2430_v36 = vrot.slane %v1840_v3, %v5093_v41  ;;  %v5257_v18 = vsel %vm2382_vm0, %v2939_v8, %v2935_v10  ;;  %v2692_v32 = vrot.slane %v5558_v61, %v5113_v24  ;;  %v2830_v63 = vrot.slane %v2083_v1, %v5098_v60  ;;  %v5563_v1 = vld [vmem:[#allocation33_spill] sm:$0xff] }
 0x370   : > { %v2835_v51 = vrot.slane %v5559_v14, %v5103_v62  ;;  %v2697_v57 = vrot.slane %v5560_v12, %v5131_v52  ;;  %v2702_v8 = vrot.slane %v5563_v1, %v5125_v27  ;;  %v5564_v62 = vld [vmem:[#allocation25_spill] sm:$0xff] }
 0x371   : > { %v2431_v7 = vsel %vm2333_vm9, %v2430_v36, %v4987_v49  ;;  %v2672_v49 = vrot.slane %v1987_v43, %v5098_v60  ;;  %v5300_v54 = vpop.xlane.xlu0 %2058  ;;  %v2840_v60 = vrot.slane %v5562_v21, %v5110_v29  ;;  %v2845_v36 = vrot.slane %v5564_v62, %v5119_v20 }
 0x372   : > { %v2436_v39 = vsel %vm2340_vm10, %v2435_v35, %v2431_v7  ;;  %v1984_v0 = vpop.xlane.xlu1 %1983  ;;  %v5565_v7 = vld [vmem:[#allocation22_spill] sm:$0xff] }
 0x373   : > { %v2441_v40 = vsel %vm2347_vm11, %v2440_v5, %v2436_v39  ;;  %v2667_v45 = vrot.slane %v1984_v0, %v5093_v41  ;;  %v5566_v0 = vld [vmem:[#allocation32_spill] sm:$0xff] }
 0x374   : > { %v2446_v31 = vsel %vm2354_vm12, %v2445_v33, %v2441_v40  ;;  %v2850_v33 = vrot.slane %v5565_v7, %v5113_v24 }
 0x375   : > { %v2668_v15 = vsel %vm2333_vm9, %v2667_v45, %v5554_v25  ;;  %v2451_v16 = vsel %vm2361_vm13, %v2450_v17, %v2446_v31  ;;  %v2855_v17 = vrot.slane %v5566_v0, %v5131_v52  ;;  %v5567_v45 = vld [vmem:[#allocation29_spill] sm:$0xff]  ;;  %v1864_v20 = vpop.xlane.xlu0 %1863 }
 0x376   : > { %v2673_v43 = vsel %vm2340_vm10, %v2672_v49, %v2668_v15  ;;  %v2080_v58 = vpop.xlane.xlu1 %2079  ;;  %v2456_v2 = vsel %vm2368_vm14, %v2455_v9, %v2451_v16  ;;  %v2860_v9 = vrot.slane %v5567_v45, %v5125_v27 }
 0x377   : > { %v2678_v38 = vsel %vm2347_vm11, %v2677_v46, %v2673_v43  ;;  %v2825_v6 = vrot.slane %v2080_v58, %v5093_v41  ;;  %v2461_v19 = vsel %vm2375_vm15, %v2460_v50, %v2456_v2  ;;  %v5561_v41 = vld [vmem:[#allocation30_spill] sm:$0xff]  ;;  %v5568_v46 = vld [vmem:[#allocation17_spill] sm:$0xff] }
 0x378   : > { %v2683_v26 = vsel %vm2354_vm12, %v2682_v59, %v2678_v38  ;;  %v2466_v28 = vsel %vm2382_vm0, %v2465_v37, %v2461_v19  ;;  %v2384_v50 = vadd.s32 4294967184, %v5568_v46  ;;  %v2391_v52 = vadd.s32 4294967176, %v5568_v46 }
 0x379   : > { %v2826_v44 = vsel %vm2333_vm9, %v2825_v6, %v5561_v41  ;;  %v2688_v22 = vsel %vm2361_vm13, %v2687_v42, %v2683_v26  ;;  %v1960_v23 = vpop.xlane.xlu0 %1959  ;;  %vm2963_vm9 = vcmask 1047559  }
 0x37a   : > { %v2831_v48 = vsel %vm2340_vm10, %v2830_v63, %v2826_v44  ;;  %v1819_v3 = vpop.xlane.xlu1 %1818  ;;  %v2693_v10 = vsel %vm2368_vm14, %v2692_v32, %v2688_v22  ;;  %v2387_v16 = vsub.s32 %v2384_v50, %v4103_v56  ;;  %v2394_v27 = vsub.s32 %v2391_v52, %v4103_v56 }
 0x37b   : > { %v2836_v35 = vsel %vm2347_vm11, %v2835_v51, %v2831_v48  ;;  %v2698_v5 = vsel %vm2375_vm15, %v2697_v57, %v2693_v10 }
 0x37c   : > { %v2841_v29 = vsel %vm2354_vm12, %v2840_v60, %v2836_v35  ;;  %v2703_v39 = vsel %vm2382_vm0, %v2702_v8, %v2698_v5  ;;  %v2470_v13 = vrot.slane %v1864_v20, %v2387_v16  ;;  %v2475_v4 = vrot.slane %v5248_v34, %v2394_v27  ;;  %v5571_v20 = vld [vmem:[#allocation23_spill] sm:$0xff] }
 0x37d   : > { %v2846_v40 = vsel %vm2361_vm13, %v2845_v36, %v2841_v29  ;;  %v2008_v37 = vpop.xlane.xlu0 %2007  ;;  %v2395_v42 = vrot.slane %v1819_v3, %v2394_v27  ;;  %v2628_v61 = vrot.slane %v1960_v23, %v2387_v16  ;;  %v2791_v60 = vrot.slane %v5300_v54, %v2394_v27 }
 0x37e   : > { %v1915_v49 = vpop.xlane.xlu1 %1914  ;;  %v2851_v31 = vsel %vm2368_vm14, %v2850_v33, %v2846_v40  ;;  %v2471_v58 = vsel %vm2389_vm1, %v2470_v13, %v2466_v28  ;;  %v2707_v38 = vrot.slane %v2008_v37, %v2387_v16  ;;  %v2159_v54 = vstv %s5346_s26  ;;  %s5402_s26 = scalar_lea.hbm %s5510_s13, %s5388_s21 }
 0x37f   : > { %v2856_v24 = vsel %vm2375_vm15, %v2855_v17, %v2851_v31  ;;  %v2476_v19 = vsel %vm2396_vm2, %v2475_v4, %v2471_v58  ;;  %v2554_v28 = vrot.slane %v1915_v49, %v2394_v27  ;;  %v2629_v12 = vsel %vm2389_vm1, %v2628_v61, %v5216_v30  ;;  %v5572_v31 = vld [vmem:[#allocation27_spill] sm:$0xff] }
 0x380   : > { %v2861_v25 = vsel %vm2382_vm0, %v2860_v9, %v2856_v24  ;;  %v2708_v34 = vsel %vm2389_vm1, %v2707_v38, %v2703_v39  ;;  %vm5364_vm10 = vcmp.lt.s32.totalorder %v5568_v46, %v2159_v54 }
 0x381   : > { %v2152_v8 = vpop.xlane.xlu0 %2151 }
 0x382   : > { %v1963_v15 = vpop.xlane.xlu1 %1962  ;;  %v2944_v36 = vrot.slane %v2152_v8, %v2387_v16 }
 0x383   : > { %v2633_v63 = vrot.slane %v1963_v15, %v2394_v27 }
 0x385   : > { %v2634_v44 = vsel %vm2396_vm2, %v2633_v63, %v2629_v12 }
 0x386   : > { %v2107_v59 = vpop.xlane.xlu1 %2106 }
 0x387   : > { %v2870_v35 = vrot.slane %v2107_v59, %v2394_v27 }
 0x389   : > { %v1070_v9 = vpop.permute.xlu0 %1069 }
 0x38a   : > { %v1816_v43 = vpop.xlane.xlu1 %1815 }
 0x38b   : > { %v2388_v2 = vrot.slane %v1816_v43, %v2387_v16 }
 0x38d   : > { %v2390_v6 = vsel %vm2389_vm1, %v2388_v2, %v5167_v55  ;;  %v2712_v55 = vrot.slane %v5268_v53, %v2394_v27 }
 0x38e   : > { %v2397_v56 = vsel %vm2396_vm2, %v2395_v42, %v2390_v6  ;;  %v1912_v32 = vpop.xlane.xlu1 %1911 }
 0x38f   : > { %v2952_v26 = vsel %vm2951_vm3, %v2476_v19, %v2397_v56  ;;  %v2549_v14 = vrot.slane %v1912_v32, %v2387_v16 }
 0x391   : > { %v2550_v51 = vsel %vm2389_vm1, %v2549_v14, %v5241_v11  ;;  %v2713_v11 = vsel %vm2396_vm2, %v2712_v55, %v2708_v34 }
 0x392   : > { %v2555_v57 = vsel %vm2396_vm2, %v2554_v28, %v2550_v51  ;;  %v2056_v41 = vpop.xlane.xlu1 %2055 }
 0x393   : > { %v2954_v22 = vsel %vm2953_vm4, %v2555_v57, %v2952_v26  ;;  %v2786_v21 = vrot.slane %v2056_v41, %v2387_v16 }
 0x394   : > { %v2956_v1 = vsel %vm2955_vm5, %v2634_v44, %v2954_v22 }
 0x395   : > { %v2787_v53 = vsel %vm2389_vm1, %v2786_v21, %v5244_v47  ;;  %v2958_v30 = vsel %vm2957_vm6, %v2713_v11, %v2956_v1  ;;  %v2945_v47 = vsel %vm2389_vm1, %v2944_v36, %v5257_v18 }
 0x396   : > { %v2792_v48 = vsel %vm2396_vm2, %v2791_v60, %v2787_v53  ;;  %v2104_v3 = vpop.xlane.xlu1 %2103 }
 0x397   : > { %v2865_v10 = vrot.slane %v2104_v3, %v2387_v16  ;;  %v2960_v62 = vsel %vm2959_vm7, %v2792_v48, %v2958_v30  ;;  %v5573_v16 = vld [vmem:[#allocation31_spill] sm:$0xff] }
 0x399   : > { %v2866_v5 = vsel %vm2389_vm1, %v2865_v10, %v2861_v25 }
 0x39a   : > { %v2155_v7 = vpop.xlane.xlu1 %2154  ;;  %v2871_v33 = vsel %vm2396_vm2, %v2870_v35, %v2866_v5 }
 0x39b   : > { %v2949_v29 = vrot.slane %v2155_v7, %v2394_v27  ;;  %v2962_v39 = vsel %vm2961_vm8, %v2871_v33, %v2960_v62 }
 0x39d   : > { %v2950_v17 = vsel %vm2396_vm2, %v2949_v29, %v2945_v47 }
 0x39e   : > { %v2964_v40 = vsel %vm2963_vm9, %v2950_v17, %v2962_v39  ;;  %v1076_v24 = vpop.permute.xlu1 %1075 }
 0x39f   : > { %v2966_v45 = vsel %vm5364_vm10, %v2964_v40, -1e+09 }
 0x3a0   : > { %2967 = vmax.xlane.f32.xlu0 %v2966_v45 }
 0x3b6   : > { %2980 = vperm.xlu0 %3408, %v5571_v20   ;;  %v958_v49 = vpop.xlane.xlu0 %957 }
 0x3b7   : > { %3677 = vrcp.f32 %v958_v49 }
 0x3c1   : > { %v3678_v18 = vpop.eup %3677 }
 0x3c2   : > { %v960_v46 = vmul.f32 %v3678_v18, %v5572_v31 }
 0x3c4   : > { %v1072_v50 = vmul.f32 %v1070_v9, %v960_v46 }
 0x3c6   : > { %1073 = vst [vmem:[%s5526_s27] sm:$0xff] %v1072_v50 }
 0x3cf   : > { %v1052_v25 = vpop.xlane.xlu1 %1051 }
 0x3d0   : > { %3679 = vrcp.f32 %v1052_v25 }
 0x3da   : > { %v3680_v15 = vpop.eup %3679 }
 0x3db   : > { %v1054_v52 = vmul.f32 %v3680_v15, %v5573_v16 }
 0x3dd   : > { %v1078_v23 = vmul.f32 %v1076_v24, %v1054_v52 }
 0x3df   : > { %1079 = vst [vmem:[%s502_s17] sm:$0xff] %v1078_v23  ;;  %s3702_s17 = scalar_lea.vmem %s3701_s18, 256 }
 0x3e0   : > { %p3704_p4 = scmp.lt.s32.totalorder %s3702_s17, %s3696_s28 }
 0x3e2   : > { %p3705_p5 = por %p3704_p4, %p3703_p3 }
 0x3e4   : > { %p3706_p6 = pnand %p3705_p5, %p3699_p2 }
 0x42d   : > { %v2968_v59 = vpop.xlane.xlu0 %2967 }
 0x42e   : > { %v2969_v13 = vsub.f32 %v2966_v45, %v2968_v59 }
 0x430   : > { %v2970_v27 = vmul.f32 1.442695, %v2969_v13 }
 0x432   : > { %3681 = vpow2.f32 %v2970_v27 }
 0x43c   : > { %v5383_v37 = vpop.eup %3681 }
 0x43d   : > { %2972 = vadd.xlane.f32.xlu1 %v5383_v37 }
 0x43e   : > { %3709 = shalt.err (!%p3706_p6)
}
 0x43f   : > { %s3710_s30 = scalar_lea.hbm %s5394_s19, 128  ;;  %s3714_s5 = scalar_lea.hbm %s5511_s14, 256 }
 0x440   : > { %p3711_p7 = scmp.ne.s32.totalorder %s5394_s19, %s3710_s30  ;;  %p3715_p12 = scmp.lt.u32.totalorder %s5394_s19, %s5511_s14 }
 0x441   : > { %p3716_p13 = scmp.lt.u32.totalorder %s3714_s5, %s3710_s30  ;;  %p3718_p1 = scmp.lt.u32.totalorder %s3710_s30, %s5394_s19 }
 0x442   : > { %p3712_p10 = pnand %p3711_p7, %p3965_p8 }
 0x443   : > { %p3717_p0 = por %p3716_p13, %p3715_p12 }
 0x444   : > { %p3713_p11 = pneg %p3712_p10 }
 0x445   : > { %p3719_p2 = por %p3718_p1, %p3717_p0 }
 0x447   : > { %p3720_p3 = pnand %p3719_p2, %p3713_p11 }
 0x449   : > { %3723 = shalt.err (!%p3720_p3)
}
 0x44a   : > { %3350 = dma.vmem_to_hbm [thread:$0]  (%p3965_p8), %s5396_s20, 128, %s5394_s19, %s5404_s0  }
 0x44b   : > { %s5574_s28 = scalar_lea.vmem [#allocation4], %s5375_s23  ;;  %s5575_s27 = sand.u32 1, %s3812_s29  }
 0x44c   : > { %s3009_s17 = sshll.u32 %s5574_s28, 4  ;;  %s2986_s24 = scalar_lea.sflag [#allocation5], %s5575_s27  ;;  %s3010_s17 = int_to_ptr.vmem [resolvable:$true] %s3009_s17 }
 0x44d   : > { %s3724_s25 = scalar_lea.vmem %s3010_s17, 128  ;;  %s3831_s30 = smov [#allocation4]  }
 0x44e   : > { %p3725_p4 = scmp.ne.s32.totalorder %s3010_s17, %s3724_s25  ;;  %s3728_s5 = sshll.u32 %s3831_s30, 4  ;;  %s3729_s5 = int_to_ptr.vmem [resolvable:$false] %s3728_s5 }
 0x44f   : > { %s3730_s18 = scalar_lea.vmem %s3729_s5, 256  ;;  %p3731_p7 = scmp.lt.s32.totalorder %s3010_s17, %s3729_s5 }
 0x450   : > { %p3726_p5 = pnand %p3725_p4, %p3965_p8  ;;  %p3732_p10 = scmp.lt.s32.totalorder %s3730_s18, %s3724_s25 }
 0x452   : > { %p3727_p6 = pneg %p3726_p5  ;;  %p3733_p11 = por %p3732_p10, %p3731_p7 }
 0x454   : > { %p3734_p12 = pnand %p3733_p11, %p3727_p6 }
 0x456   : > { %3737 = shalt.err (!%p3734_p12)
}
 0x457   : > { %s3738_s19 = scalar_lea.hbm %s5402_s26, 128  ;;  %s3742_s27 = scalar_lea.hbm %s5510_s13, 256 }
 0x458   : > { %p3739_p13 = scmp.ne.s32.totalorder %s5402_s26, %s3738_s19  ;;  %p3743_p2 = scmp.lt.u32.totalorder %s5402_s26, %s5510_s13 }
 0x459   : > { %p3744_p3 = scmp.lt.u32.totalorder %s3742_s27, %s3738_s19  ;;  %p3746_p5 = scmp.lt.u32.totalorder %s3738_s19, %s5402_s26 }
 0x45a   : > { %p3740_p0 = pnand %p3739_p13, %p3965_p8 }
 0x45b   : > { %p3745_p4 = por %p3744_p3, %p3743_p2 }
 0x45c   : > { %p3741_p1 = pneg %p3740_p0 }
 0x45d   : > { %p3747_p6 = por %p3746_p5, %p3745_p4 }
 0x45f   : > { %p3748_p7 = pnand %p3747_p6, %p3741_p1 }
 0x461   : > { %3751 = shalt.err (!%p3748_p7)
}
 0x462   : > { %3349 = dma.vmem_to_hbm [thread:$0]  (%p3965_p8), %s3010_s17, 128, %s5402_s26, %s2986_s24   ;;  %v5576_v2 = vmov 0.0   ;;  %v2981_v6 = vpop.permute.xlu0 %2980 }
 0x463   : > { %v3215_v4 = vsel %vm5364_vm10, 1.0, %v5576_v2  ;;  %s509_s25 = scalar_lea.vmem [#allocation8], %s5375_s23  ;;  %s5458_s28 = scalar_lea.hbm %s5512_s15, %s5388_s21 }
 0x464   : > { %s3035_s18 = sshll.u32 %s509_s25, 4  ;;  %s3832_s17 = smov [#allocation8]   ;;  %s3036_s18 = int_to_ptr.vmem [resolvable:$true] %s3035_s18 }
 0x465   : > { %s3752_s26 = scalar_lea.vmem %s3036_s18, 128  ;;  %s3756_s24 = sshll.u32 %s3832_s17, 4  ;;  %s3757_s24 = int_to_ptr.vmem [resolvable:$false] %s3756_s24 }
 0x466   : > { %p3753_p10 = scmp.ne.s32.totalorder %s3036_s18, %s3752_s26  ;;  %s3758_s23 = scalar_lea.vmem %s3757_s24, 256 }
 0x467   : > { %p3759_p13 = scmp.lt.s32.totalorder %s3036_s18, %s3757_s24  ;;  %p3760_p0 = scmp.lt.s32.totalorder %s3758_s23, %s3752_s26 }
 0x468   : > { %p3754_p11 = pnand %p3753_p10, %p3965_p8 }
 0x469   : > { %p3761_p1 = por %p3760_p0, %p3759_p13 }
 0x46a   : > { %p3755_p12 = pneg %p3754_p11 }
 0x46c   : > { %p3762_p2 = pnand %p3761_p1, %p3755_p12 }
 0x4ca   : > { %v2973_v43 = vpop.xlane.xlu1 %2972 }
 0x4cb   : > { %3683 = vrcp.f32 %v2973_v43 }
 0x4d5   : > { %v3684_v58 = vpop.eup %3683 }
 0x4d6   : > { %v2975_v42 = vmul.f32 %v3684_v58, %v5383_v37 }
 0x4d8   : > { %v2978_v38 = vmul.f32 %v3215_v4, %v2975_v42 }
 0x4da   : > { %v2983_v19 = vmul.f32 %v2981_v6, %v2978_v38 }
 0x4dc   : > { %2984 = vst [vmem:[%s509_s25] sm:$0xff] %v2983_v19 }
 0x4dd   : > { %3765 = shalt.err (!%p3762_p2)
}
 0x4de   : > { %s3766_s21 = scalar_lea.hbm %s5458_s28, 128  ;;  %s3770_s5 = scalar_lea.hbm %s5512_s15, 256 }
 0x4df   : > { %p3767_p3 = scmp.ne.s32.totalorder %s5458_s28, %s3766_s21  ;;  %p3771_p6 = scmp.lt.u32.totalorder %s5458_s28, %s5512_s15 }
 0x4e0   : > { %p3772_p7 = scmp.lt.u32.totalorder %s3770_s5, %s3766_s21  ;;  %p3774_p11 = scmp.lt.u32.totalorder %s3766_s21, %s5458_s28 }
 0x4e1   : > { %p3768_p4 = pnand %p3767_p3, %p3965_p8 }
 0x4e2   : > { %p3773_p10 = por %p3772_p7, %p3771_p6 }
 0x4e3   : > { %p3769_p5 = pneg %p3768_p4 }
 0x4e4   : > { %p3775_p12 = por %p3774_p11, %p3773_p10 }
 0x4e6   : > { %p3776_p13 = pnand %p3775_p12, %p3769_p5 }
 0x4e8   : > { %3779 = shalt.err (!%p3776_p13)
}
 0x4e9   : > { %3351 = dma.vmem_to_hbm [thread:$0]  (%p3965_p8), %s3036_s18, 128, %s5458_s28, %s5404_s0  }
 0x4ea PF: > { %s5577_s20 = sld [smem:[#allocation12_spill]]  ;;  %p3365_p0 = scmp.ge.s32.totalorder %s3820_s16, 2 }
 0x4ec   : > { %p3356_p1 = pnand %p3365_p0, %p3969_p9 }
 0x4f0   : > { %s3047_s17 = sand.u32 1, %s5577_s20  }
 0x4f1   : > { %s3048_s24 = scalar_lea.sflag [#allocation5], %s3047_s17 }
 0x4f2   : > { %3799 = dma.done.wait (!%p3356_p1), %s3048_s24, 128  }
 0x4f3   : > { %3801 = vsyncadd (!%p3356_p1), %s3048_s24, 4294967168  ;;  %s5579_s23 = sadd.s32 4294967294, %s3820_s16  }
 0x4f4   : > { %s3056_s21 = sand.u32 1, %s5579_s23  }
 0x4f5   : > { %s3057_s27 = scalar_lea.sflag [#allocation7], %s3056_s21 }
 0x4f6   : > { %3803 = dma.done.wait (!%p3356_p1), %s3057_s27, 256  }
 0x4f7   : > { %3805 = vsyncadd (!%p3356_p1), %s3057_s27, 4294967040  ;;  %s5580_s16 = sld [smem:[#allocation14_spill]]  ;;  %s5581_s22 = sld [smem:[#allocation13_spill]] }
 0x4f8   : > { %s5582_s30 = sld [smem:[#allocation15_spill]]  ;;  %s5583_s28 = smov %s3812_s29 }
 0x4fd   : > { %p33_p8 = scmp.ge.s32.totalorder %s5580_s16, 4   ;;  %s5584_s29 = smov %s5581_s22 }
 0x4ff   :  { %35 = sbr.rel (!%p33_p8) target bundleno = 17 (0x11), region = 141 }
 0x506   :  { %3071 = vsyncpa [#allocation5], 1 }
 0x507   :  { %3073 = vsyncpa [#allocation5 + $0x1], 1 }
 0x508   :  { %3074 = vsyncpa [#allocation7], 1 }
 0x509   :  { %3076 = vsyncpa [#allocation7 + $0x1], 1 }

</bundles_post_ra>
